<compile_context>
chip_gen: v7x
topology: tpu7x:2x2x1
jax: 0.10.0
libtpu: 0.0.40
codegen_flags: <defaults>
</compile_context>

<pallas_src>
import functools

import jax
import jax.numpy as jnp
from jax.experimental import pallas as pl
from jax.experimental.pallas import tpu as pltpu

EPS = 1e-5  # BatchNorm2d default eps


# ---------------- hardware-aware knobs ----------------

def _device_kind():
    try:
        return jax.devices()[0].device_kind.lower()
    except Exception:
        return ""


def _cout_tile_max():
    # v5e (and older) MXUs are 128 wide; v6e/v7x MXUs are 256 wide.
    kind = _device_kind()
    if any(t in kind for t in ("v2", "v3", "v4", "v5")):
        return 128
    return 256


def _vmem_cap_bytes():
    # generation-aware scoped-VMEM ceiling (v7x: 64 MiB physical per TC, v5e/v6e: 128 MiB).
    phys = None
    try:
        phys = int(getattr(pltpu.get_tpu_info(), "vmem_capacity_bytes", 0)) or None
    except Exception:
        phys = None
    if phys is None:
        phys = (64 << 20) if "v7" in _device_kind() else (128 << 20)
    return max(phys - (8 << 20), 32 << 20)


def _compiler_params(vmem_estimate_bytes):
    vmem = int(min(max(int(vmem_estimate_bytes * 1.25) + (8 << 20), 32 << 20), _vmem_cap_bytes()))
    return pltpu.CompilerParams(
        # The Cout-tile axis must run sequentially: the first step builds the VMEM-cached
        # pooled/padded activation that every later Cout tile reuses.
        dimension_semantics=("arbitrary",),
        vmem_limit_bytes=vmem,
    )


def _pick_row_chunk(Hp, bytes_per_row, budget=8 << 20):
    """Largest divisor HB of Hp whose im2col row-chunk stays under `budget` bytes.

    Bounds the resident (N*HB*Wp, 9*Cin) im2col buffer instead of materializing the full 9x
    activation blow-up (the VMEM killer on v7x's 64 MiB)."""
    best = 1
    for hb in range(1, Hp + 1):
        if Hp % hb == 0 and hb * bytes_per_row <= budget:
            best = hb
    return best


# ---------------- shared in-kernel conv + BN + ReLU body ----------------

def _conv3x3_bn_relu(xp_s, w_ref, g_ref, b_ref, acc_s, sum_s, *, HB):
    """xp_s: (N, Hp+2, Wp+2, Cin) padded activation (bf16).  Returns (N*Hp*Wp, tc) f32."""
    N, Hp, Wp, tc = acc_s.shape
    Cin = xp_s.shape[-1]
    n_chunks = Hp // HB
    M = N * Hp * Wp

    sum_s[...] = jnp.zeros(sum_s.shape, sum_s.dtype)

    def conv_chunk(c):
        h0 = c * HB
        # (N, HB+2, Wp+2, Cin) window; H is an untiled dim so the dynamic offset is cheap.
        win = xp_s[:, pl.ds(h0, HB + 2), :, :]
        # chunked im2col: only N*HB*Wp rows resident at a time, single big-K matmul per chunk.
        patches = jnp.concatenate(
            [win[:, dy:dy + HB, dx:dx + Wp, :] for dy in range(3) for dx in range(3)],
            axis=-1,
        ).reshape(N * HB * Wp, 9 * Cin)
        # bf16 x bf16 -> f32 accumulate: native MXU fast path on every generation.
        part = jnp.dot(patches.astype(w_ref.dtype), w_ref[...],
                       preferred_element_type=jnp.float32)
        acc_s[:, pl.ds(h0, HB), :, :] = part.reshape(N, HB, Wp, tc)
        sum_s[...] += jnp.sum(part, axis=0, keepdims=True)

    if n_chunks == 1:
        conv_chunk(0)
    else:
        def body(c, carry):
            conv_chunk(c)
            return carry
        jax.lax.fori_loop(0, n_chunks, body, 0)

    # BatchNorm2d (batch stats): two-pass centered variance (robust vs E[x^2]-mean^2 cancellation).
    # NOTE: the conv bias is intentionally omitted - it is exactly cancelled by the mean subtraction.
    inv_m = 1.0 / float(M)
    mean = sum_s[...] * inv_m                                    # (1, tc)
    d = acc_s[...].reshape(M, tc) - mean                         # centered pre-BN activations, f32
    var = jnp.maximum(jnp.sum(d * d, axis=0, keepdims=True) * inv_m, 0.0)
    scale = g_ref[...] * jax.lax.rsqrt(var + EPS)                # (1, tc)
    return jnp.maximum(d * scale + b_ref[...], 0.0)              # affine + ReLU


# ---------------- Pallas kernels ----------------

def _pool_conv_bn_relu_kernel(x_hbm, w_ref, g_ref, b_ref, o_ref,
                              raw_s, xp_s, acc_s, sum_s, *, HB):
    # x_hbm : (N, Hp, 2, Wp, 2*Cin) raw input, left in HBM (memory_space=pl.ANY)
    # w_ref : (9*Cin, tc) bf16 tap-major weight tile
    # o_ref : (N, Hp+2, Wp+2, tc)   conv1+BN+ReLU output stored WITH a zero halo for conv2
    N, Hp, Wp, tc = acc_s.shape
    Cin = xp_s.shape[-1]

    @pl.when(pl.program_id(0) == 0)
    def _():
        # One-time (first Cout tile): single DMA of the raw input, fused MaxPool2d(2), and the
        # zero-padded pooled activation built in a persistent VMEM scratch.  All later Cout tiles
        # reuse it (the Cout grid axis is sequential), removing the per-tile pool/pad recompute
        # and any pipeline double-buffering of the replicated activation.
        pltpu.sync_copy(x_hbm, raw_s)
        x = raw_s[...]                                                  # f32
        hmax = jnp.maximum(x[:, :, 0, :, :], x[:, :, 1, :, :])          # (N, Hp, Wp, 2*Cin)
        pooled = jnp.maximum(hmax[..., :Cin], hmax[..., Cin:])          # (N, Hp, Wp, Cin)
        # zero only the 4 halo strips; interior stored exactly once (no full-buffer zero pass).
        xp_s[:, 0:1, :, :] = jnp.zeros((N, 1, Wp + 2, Cin), xp_s.dtype)
        xp_s[:, Hp + 1:Hp + 2, :, :] = jnp.zeros((N, 1, Wp + 2, Cin), xp_s.dtype)
        xp_s[:, :, 0:1, :] = jnp.zeros((N, Hp + 2, 1, Cin), xp_s.dtype)
        xp_s[:, :, Wp + 1:Wp + 2, :] = jnp.zeros((N, Hp + 2, 1, Cin), xp_s.dtype)
        xp_s[:, 1:Hp + 1, 1:Wp + 1, :] = pooled.astype(xp_s.dtype)

    y = _conv3x3_bn_relu(xp_s, w_ref, g_ref, b_ref, acc_s, sum_s, HB=HB)

    # store WITH a zero halo so conv2 needs no padding pass; zero only the halo strips.
    o_ref[:, 0:1, :, :] = jnp.zeros((N, 1, Wp + 2, tc), o_ref.dtype)
    o_ref[:, Hp + 1:Hp + 2, :, :] = jnp.zeros((N, 1, Wp + 2, tc), o_ref.dtype)
    o_ref[:, :, 0:1, :] = jnp.zeros((N, Hp + 2, 1, tc), o_ref.dtype)
    o_ref[:, :, Wp + 1:Wp + 2, :] = jnp.zeros((N, Hp + 2, 1, tc), o_ref.dtype)
    o_ref[:, 1:Hp + 1, 1:Wp + 1, :] = y.reshape(N, Hp, Wp, tc).astype(o_ref.dtype)


def _conv_bn_relu_kernel(xp_hbm, w_ref, g_ref, b_ref, o_ref, xp_s, acc_s, sum_s, *, HB):
    # xp_hbm: (N, Hp+2, Wp+2, Cin) pre-padded bf16 activation left in HBM; o_ref: (N, Hp, Wp, tc)
    N, Hp, Wp, tc = acc_s.shape

    @pl.when(pl.program_id(0) == 0)
    def _():
        # One-time: DMA the halo-carrying conv1 activation (kept in bf16 end-to-end) into VMEM;
        # reused by every Cout tile.
        pltpu.sync_copy(xp_hbm, xp_s)

    y = _conv3x3_bn_relu(xp_s, w_ref, g_ref, b_ref, acc_s, sum_s, HB=HB)
    o_ref[...] = y.reshape(N, Hp, Wp, tc).astype(o_ref.dtype)   # lane-dense, unmasked full store


# ---------------- wrappers ----------------

def _prep_weight(w_oihw):
    # PyTorch conv weight [Cout, Cin, 3, 3] -> tap-major [9*Cin, Cout] in bf16
    # (bf16 operands + f32 accumulation is the MXU fast path; halves weight DMA/VMEM).
    Cout, Cin, kh, kw = w_oihw.shape
    return jnp.transpose(w_oihw, (2, 3, 1, 0)).reshape(kh * kw * Cin, Cout).astype(jnp.bfloat16)


def pool_conv_bn_relu(x5d, w_oihw, gamma, beta, out_dtype, cout_tile=None):
    # x5d: (N, Hp, 2, Wp, 2*Cin); returns (N, Hp+2, Wp+2, Cout) with zero halo.
    N, Hp, _, Wp, two_cin = x5d.shape
    Cin = two_cin // 2
    Cout = w_oihw.shape[0]
    w2d = _prep_weight(w_oihw)
    tc = min(Cout, cout_tile if cout_tile is not None else _cout_tile_max())
    HB = _pick_row_chunk(Hp, N * Wp * (9 * Cin * 2 + tc * 4))
    out_isz = jnp.dtype(out_dtype).itemsize
    est = (int(x5d.size) * x5d.dtype.itemsize                 # raw input copy (VMEM scratch)
           + N * (Hp + 2) * (Wp + 2) * Cin * 2                # padded pooled activation (bf16)
           + N * Hp * Wp * tc * 4                             # pre-BN accumulator (f32)
           + 2 * (9 * Cin * tc * 2 + 2 * tc * 4)              # double-buffered weight/gamma/beta
           + 2 * N * (Hp + 2) * (Wp + 2) * tc * out_isz       # double-buffered output tile
           + N * HB * Wp * (9 * Cin * 2 + tc * 4))            # im2col chunk + its f32 dot result
    return pl.pallas_call(
        functools.partial(_pool_conv_bn_relu_kernel, HB=HB),
        grid=(pl.cdiv(Cout, tc),),
        in_specs=[
            pl.BlockSpec(memory_space=pl.ANY),                       # raw input stays in HBM
            pl.BlockSpec((9 * Cin, tc), lambda j: (0, j)),           # weight tile
            pl.BlockSpec((1, tc), lambda j: (0, j)),                 # gamma tile
            pl.BlockSpec((1, tc), lambda j: (0, j)),                 # beta tile
        ],
        out_specs=pl.BlockSpec((N, Hp + 2, Wp + 2, tc), lambda j: (0, 0, 0, j)),
        out_shape=jax.ShapeDtypeStruct((N, Hp + 2, Wp + 2, Cout), out_dtype),
        scratch_shapes=[
            pltpu.VMEM(tuple(x5d.shape), x5d.dtype),                 # raw input (single copy)
            pltpu.VMEM((N, Hp + 2, Wp + 2, Cin), jnp.bfloat16),      # padded pooled activation
            pltpu.VMEM((N, Hp, Wp, tc), jnp.float32),                # pre-BN conv accumulator
            pltpu.VMEM((1, tc), jnp.float32),                        # per-channel sums
        ],
        compiler_params=_compiler_params(est),
    )(x5d, w2d, gamma.reshape(1, Cout), beta.reshape(1, Cout))


def conv_bn_relu(xp_nhwc, w_oihw, gamma, beta, out_dtype, cout_tile=None):
    # xp_nhwc: (N, Hp+2, Wp+2, Cin) activation WITH zero halo; returns (N, Hp, Wp, Cout).
    N, hp2, wp2, Cin = xp_nhwc.shape
    Hp, Wp = hp2 - 2, wp2 - 2
    Cout = w_oihw.shape[0]
    w2d = _prep_weight(w_oihw)
    tc = min(Cout, cout_tile if cout_tile is not None else _cout_tile_max())
    HB = _pick_row_chunk(Hp, N * Wp * (9 * Cin * 2 + tc * 4))
    est = (int(xp_nhwc.size) * xp_nhwc.dtype.itemsize
           + N * Hp * Wp * tc * 4
           + 2 * (9 * Cin * tc * 2 + 2 * tc * 4)
           + 2 * N * Hp * Wp * tc * jnp.dtype(out_dtype).itemsize
           + N * HB * Wp * (9 * Cin * 2 + tc * 4))
    return pl.pallas_call(
        functools.partial(_conv_bn_relu_kernel, HB=HB),
        grid=(pl.cdiv(Cout, tc),),
        in_specs=[
            pl.BlockSpec(memory_space=pl.ANY),                       # padded activation in HBM
            pl.BlockSpec((9 * Cin, tc), lambda j: (0, j)),
            pl.BlockSpec((1, tc), lambda j: (0, j)),
            pl.BlockSpec((1, tc), lambda j: (0, j)),
        ],
        out_specs=pl.BlockSpec((N, Hp, Wp, tc), lambda j: (0, 0, 0, j)),
        out_shape=jax.ShapeDtypeStruct((N, Hp, Wp, Cout), out_dtype),
        scratch_shapes=[
            pltpu.VMEM(tuple(xp_nhwc.shape), xp_nhwc.dtype),         # padded activation (single copy)
            pltpu.VMEM((N, Hp, Wp, tc), jnp.float32),
            pltpu.VMEM((1, tc), jnp.float32),
        ],
        compiler_params=_compiler_params(est),
    )(xp_nhwc, w2d, gamma.reshape(1, Cout), beta.reshape(1, Cout))


def down_forward(x_nchw, p, interlayer_dtype=jnp.bfloat16, cout_tile=None):
    N, Cin, H, W = x_nchw.shape
    assert H % 2 == 0 and W % 2 == 0, "MaxPool2d(2) path expects even spatial dims"
    Hp, Wp = H // 2, W // 2
    x = jnp.transpose(x_nchw, (0, 2, 3, 1))          # NCHW -> NHWC (boundary layout change)
    x = x.reshape(N, Hp, 2, Wp, 2 * Cin)             # free regrouping: exposes the 2x2 pool window
    y1 = pool_conv_bn_relu(x, p["w1"], p["g1"], p["be1"],
                           out_dtype=interlayer_dtype, cout_tile=cout_tile)
    y2 = conv_bn_relu(y1, p["w2"], p["g2"], p["be2"],
                      out_dtype=jnp.float32, cout_tile=cout_tile)
    return jnp.transpose(y2, (0, 3, 1, 2))           # NHWC -> NCHW


# ---------------- pure-JAX reference for validation ----------------

def _ref_conv_bn_relu(x_nchw, w, b, g, be):
    y = jax.lax.conv_general_dilated(
        x_nchw, w, window_strides=(1, 1), padding=((1, 1), (1, 1)),
        dimension_numbers=("NCHW", "OIHW", "NCHW"))
    y = y + b[None, :, None, None]
    mean = jnp.mean(y, axis=(0, 2, 3), keepdims=True)
    var = jnp.mean((y - mean) ** 2, axis=(0, 2, 3), keepdims=True)
    y = (y - mean) / jnp.sqrt(var + EPS)
    y = y * g[None, :, None, None] + be[None, :, None, None]
    return jnp.maximum(y, 0.0)


def _ref_down(x, p):
    xp = jax.lax.reduce_window(x, -jnp.inf, jax.lax.max,
                               (1, 1, 2, 2), (1, 1, 2, 2), "VALID")
    y = _ref_conv_bn_relu(xp, p["w1"], p["b1"], p["g1"], p["be1"])
    y = _ref_conv_bn_relu(y, p["w2"], p["b2"], p["g2"], p["be2"])
    return y


def _make_params(key, cin, cout):
    ks = jax.random.split(key, 8)
    return {
        "w1": jax.random.normal(ks[0], (cout, cin, 3, 3), jnp.float32) * 0.1,
        "b1": jax.random.normal(ks[1], (cout,), jnp.float32) * 0.1,  # only the reference uses bias
        "g1": 1.0 + 0.1 * jax.random.normal(ks[2], (cout,), jnp.float32),
        "be1": 0.1 * jax.random.normal(ks[3], (cout,), jnp.float32),
        "w2": jax.random.normal(ks[4], (cout, cout, 3, 3), jnp.float32) * 0.1,
        "b2": jax.random.normal(ks[5], (cout,), jnp.float32) * 0.1,
        "g2": 1.0 + 0.1 * jax.random.normal(ks[6], (cout,), jnp.float32),
        "be2": 0.1 * jax.random.normal(ks[7], (cout,), jnp.float32),
    }


if __name__ == "__main__":
    # --- test 1: Down(4 -> 8) at the small suggested shapes (single Cout tile) ---
    k = jax.random.split(jax.random.PRNGKey(0), 2)
    x = jax.random.normal(k[0], (2, 4, 16, 16), jnp.float32)
    p = _make_params(k[1], 4, 8)
    out = jax.block_until_ready(down_forward(x, p))
    ref = jax.block_until_ready(_ref_down(x, p))
    assert out.shape == (2, 8, 8, 8), out.shape
    err = float(jnp.max(jnp.abs(out - ref)))
    assert err < 1e-1, f"test1 max abs err {err}"   # bf16 MXU operands + bf16 inter-layer storage

    # --- test 2: Down(4 -> 256) with a forced 128-wide Cout tile so the Cout grid has two
    #     sequential steps, exercising the cached pooled/padded activation across grid steps ---
    k2 = jax.random.split(jax.random.PRNGKey(1), 2)
    x2 = jax.random.normal(k2[0], (1, 4, 16, 16), jnp.float32)
    p2 = _make_params(k2[1], 4, 256)
    out2 = jax.block_until_ready(down_forward(x2, p2, cout_tile=128))
    ref2 = jax.block_until_ready(_ref_down(x2, p2))
    assert out2.shape == (1, 256, 8, 8), out2.shape
    err2 = float(jnp.max(jnp.abs(out2 - ref2)))
    assert err2 < 1e-1, f"test2 max abs err {err2}"

    print("KERNEL_OK")
</pallas_src>

<mosaic_0001>
module attributes {stable_mosaic.version = 11 : i64} {
  func.func @_pool_conv_bn_relu_kernel(%arg0: i32, %arg1: memref<2x8x2x8x8xf32, #tpu.memory_space<any>>, %arg2: memref<36x8xbf16, #tpu.memory_space<vmem>>, %arg3: memref<1x8xf32, #tpu.memory_space<vmem>>, %arg4: memref<1x8xf32, #tpu.memory_space<vmem>>, %arg5: memref<2x10x10x8xbf16, #tpu.memory_space<vmem>>, %arg6: memref<2x8x2x8x8xf32, #tpu.memory_space<vmem>>, %arg7: memref<2x10x10x4xbf16, #tpu.memory_space<vmem>>, %arg8: memref<2x8x8x8xf32, #tpu.memory_space<vmem>>, %arg9: memref<1x8xf32, #tpu.memory_space<vmem>>) attributes {dimension_semantics = [#tpu.dimension_semantics<arbitrary>], iteration_bounds = array<i64: 1>, scalar_prefetch = 0 : i64, scratch_operands = 4 : i64, tpu.core_type = #tpu.core_type<tc>, window_params = [{}, {transform_indices = @transform_1, window_bounds = array<i64: 36, 8>}, {transform_indices = @transform_2, window_bounds = array<i64: 1, 8>}, {transform_indices = @transform_3, window_bounds = array<i64: 1, 8>}, {transform_indices = @transform_4, window_bounds = array<i64: 2, 10, 10, 8>}]} {
    %c0_i32 = arith.constant 0 : i32
    %0 = arith.cmpi eq, %arg0, %c0_i32 : i32
    %1 = arith.extui %0 : i1 to i32
    %c0_i32_0 = arith.constant 0 : i32
    %2 = arith.cmpi ne, %1, %c0_i32_0 : i32
    scf.if %2 {
      "tpu.region"() ({
        %82 = tpu.sem_alloc : memref<!tpu.dma_semaphore, #tpu.memory_space<semaphore_mem>>
        tpu.enqueue_dma source(%arg1 : memref<2x8x2x8x8xf32, #tpu.memory_space<any>>) target(%arg6 : memref<2x8x2x8x8xf32, #tpu.memory_space<vmem>>) target_semaphore(%82 : memref<!tpu.dma_semaphore, #tpu.memory_space<semaphore_mem>>)
        tpu.wait_dma2 semaphore(%82 : memref<!tpu.dma_semaphore, #tpu.memory_space<semaphore_mem>>) src(%arg1 : memref<2x8x2x8x8xf32, #tpu.memory_space<any>>) dst(%arg6 : memref<2x8x2x8x8xf32, #tpu.memory_space<vmem>>)
        tpu.yield
      }) : () -> ()
      %c0_56 = arith.constant 0 : index
      %c0_57 = arith.constant 0 : index
      %c0_58 = arith.constant 0 : index
      %c0_59 = arith.constant 0 : index
      %c0_60 = arith.constant 0 : index
      %63 = vector.load %arg6[%c0_56, %c0_57, %c0_58, %c0_59, %c0_60] : memref<2x8x2x8x8xf32, #tpu.memory_space<vmem>>, vector<2x8x2x8x8xf32>
      %64 = vector.extract_strided_slice %63 {offsets = [0, 0, 0, 0, 0], sizes = [2, 8, 1, 8, 8], strides = [1, 1, 1, 1, 1]} : vector<2x8x2x8x8xf32> to vector<2x8x1x8x8xf32>
      %65 = vector.shape_cast %64 : vector<2x8x1x8x8xf32> to vector<2x8x8x8xf32>
      %66 = vector.extract_strided_slice %63 {offsets = [0, 0, 1, 0, 0], sizes = [2, 8, 1, 8, 8], strides = [1, 1, 1, 1, 1]} : vector<2x8x2x8x8xf32> to vector<2x8x1x8x8xf32>
      %67 = vector.shape_cast %66 : vector<2x8x1x8x8xf32> to vector<2x8x8x8xf32>
      %68 = arith.maximumf %65, %67 : vector<2x8x8x8xf32>
      %69 = vector.extract_strided_slice %68 {offsets = [0, 0, 0, 0], sizes = [2, 8, 8, 4], strides = [1, 1, 1, 1]} : vector<2x8x8x8xf32> to vector<2x8x8x4xf32>
      %70 = vector.extract_strided_slice %68 {offsets = [0, 0, 0, 4], sizes = [2, 8, 8, 4], strides = [1, 1, 1, 1]} : vector<2x8x8x8xf32> to vector<2x8x8x4xf32>
      %71 = arith.maximumf %69, %70 : vector<2x8x8x4xf32>
      %cst_61 = arith.constant 0.000000e+00 : bf16
      %72 = vector.broadcast %cst_61 : bf16 to vector<2x1x10x4xbf16>
      %c0_62 = arith.constant 0 : index
      %c0_63 = arith.constant 0 : index
      %c0_64 = arith.constant 0 : index
      %c0_65 = arith.constant 0 : index
      %73 = vector.load %arg7[%c0_62, %c0_63, %c0_64, %c0_65] : memref<2x10x10x4xbf16, #tpu.memory_space<vmem>>, vector<2x1x10x4xbf16>
      tpu.vector_store %arg7[%c0_62, %c0_63, %c0_64, %c0_65], %72 {strides = array<i32>} : memref<2x10x10x4xbf16, #tpu.memory_space<vmem>>, vector<2x1x10x4xbf16>,
      %cst_66 = arith.constant 0.000000e+00 : bf16
      %74 = vector.broadcast %cst_66 : bf16 to vector<2x1x10x4xbf16>
      %c0_67 = arith.constant 0 : index
      %c9_68 = arith.constant 9 : index
      %c0_69 = arith.constant 0 : index
      %c0_70 = arith.constant 0 : index
      %75 = vector.load %arg7[%c0_67, %c9_68, %c0_69, %c0_70] : memref<2x10x10x4xbf16, #tpu.memory_space<vmem>>, vector<2x1x10x4xbf16>
      tpu.vector_store %arg7[%c0_67, %c9_68, %c0_69, %c0_70], %74 {strides = array<i32>} : memref<2x10x10x4xbf16, #tpu.memory_space<vmem>>, vector<2x1x10x4xbf16>,
      %cst_71 = arith.constant 0.000000e+00 : bf16
      %76 = vector.broadcast %cst_71 : bf16 to vector<2x10x1x4xbf16>
      %c0_72 = arith.constant 0 : index
      %c0_73 = arith.constant 0 : index
      %c0_74 = arith.constant 0 : index
      %c0_75 = arith.constant 0 : index
      %77 = vector.load %arg7[%c0_72, %c0_73, %c0_74, %c0_75] : memref<2x10x10x4xbf16, #tpu.memory_space<vmem>>, vector<2x10x1x4xbf16>
      tpu.vector_store %arg7[%c0_72, %c0_73, %c0_74, %c0_75], %76 {strides = array<i32>} : memref<2x10x10x4xbf16, #tpu.memory_space<vmem>>, vector<2x10x1x4xbf16>,
      %cst_76 = arith.constant 0.000000e+00 : bf16
      %78 = vector.broadcast %cst_76 : bf16 to vector<2x10x1x4xbf16>
      %c0_77 = arith.constant 0 : index
      %c0_78 = arith.constant 0 : index
      %c9_79 = arith.constant 9 : index
      %c0_80 = arith.constant 0 : index
      %79 = vector.load %arg7[%c0_77, %c0_78, %c9_79, %c0_80] : memref<2x10x10x4xbf16, #tpu.memory_space<vmem>>, vector<2x10x1x4xbf16>
      tpu.vector_store %arg7[%c0_77, %c0_78, %c9_79, %c0_80], %78 {strides = array<i32>} : memref<2x10x10x4xbf16, #tpu.memory_space<vmem>>, vector<2x10x1x4xbf16>,
      %80 = arith.truncf %71 : vector<2x8x8x4xf32> to vector<2x8x8x4xbf16>
      %c0_81 = arith.constant 0 : index
      %c1_82 = arith.constant 1 : index
      %c1_83 = arith.constant 1 : index
      %c0_84 = arith.constant 0 : index
      %81 = vector.load %arg7[%c0_81, %c1_82, %c1_83, %c0_84] : memref<2x10x10x4xbf16, #tpu.memory_space<vmem>>, vector<2x8x8x4xbf16>
      tpu.vector_store %arg7[%c0_81, %c1_82, %c1_83, %c0_84], %80 {strides = array<i32>} : memref<2x10x10x4xbf16, #tpu.memory_space<vmem>>, vector<2x8x8x4xbf16>,
    } else {
    }
    %cst = arith.constant 0.000000e+00 : f32
    %3 = vector.broadcast %cst : f32 to vector<1x8xf32>
    %c0 = arith.constant 0 : index
    %c0_1 = arith.constant 0 : index
    %4 = vector.load %arg9[%c0, %c0_1] : memref<1x8xf32, #tpu.memory_space<vmem>>, vector<1x8xf32>
    tpu.vector_store %arg9[%c0, %c0_1], %3 {strides = array<i32>} : memref<1x8xf32, #tpu.memory_space<vmem>>, vector<1x8xf32>,
    %c0_2 = arith.constant 0 : index
    %c0_3 = arith.constant 0 : index
    %c0_4 = arith.constant 0 : index
    %c0_5 = arith.constant 0 : index
    %5 = vector.load %arg7[%c0_2, %c0_3, %c0_4, %c0_5] : memref<2x10x10x4xbf16, #tpu.memory_space<vmem>>, vector<2x10x10x4xbf16>
    %6 = vector.extract_strided_slice %5 {offsets = [0, 0, 0, 0], sizes = [2, 8, 8, 4], strides = [1, 1, 1, 1]} : vector<2x10x10x4xbf16> to vector<2x8x8x4xbf16>
    %7 = vector.extract_strided_slice %5 {offsets = [0, 0, 1, 0], sizes = [2, 8, 8, 4], strides = [1, 1, 1, 1]} : vector<2x10x10x4xbf16> to vector<2x8x8x4xbf16>
    %8 = vector.extract_strided_slice %5 {offsets = [0, 0, 2, 0], sizes = [2, 8, 8, 4], strides = [1, 1, 1, 1]} : vector<2x10x10x4xbf16> to vector<2x8x8x4xbf16>
    %9 = vector.extract_strided_slice %5 {offsets = [0, 1, 0, 0], sizes = [2, 8, 8, 4], strides = [1, 1, 1, 1]} : vector<2x10x10x4xbf16> to vector<2x8x8x4xbf16>
    %10 = vector.extract_strided_slice %5 {offsets = [0, 1, 1, 0], sizes = [2, 8, 8, 4], strides = [1, 1, 1, 1]} : vector<2x10x10x4xbf16> to vector<2x8x8x4xbf16>
    %11 = vector.extract_strided_slice %5 {offsets = [0, 1, 2, 0], sizes = [2, 8, 8, 4], strides = [1, 1, 1, 1]} : vector<2x10x10x4xbf16> to vector<2x8x8x4xbf16>
    %12 = vector.extract_strided_slice %5 {offsets = [0, 2, 0, 0], sizes = [2, 8, 8, 4], strides = [1, 1, 1, 1]} : vector<2x10x10x4xbf16> to vector<2x8x8x4xbf16>
    %13 = vector.extract_strided_slice %5 {offsets = [0, 2, 1, 0], sizes = [2, 8, 8, 4], strides = [1, 1, 1, 1]} : vector<2x10x10x4xbf16> to vector<2x8x8x4xbf16>
    %14 = vector.extract_strided_slice %5 {offsets = [0, 2, 2, 0], sizes = [2, 8, 8, 4], strides = [1, 1, 1, 1]} : vector<2x10x10x4xbf16> to vector<2x8x8x4xbf16>
    %15 = tpu.concatenate %6, %7, %8, %9, %10, %11, %12, %13, %14 in 3 : vector<2x8x8x4xbf16>, vector<2x8x8x4xbf16>, vector<2x8x8x4xbf16>, vector<2x8x8x4xbf16>, vector<2x8x8x4xbf16>, vector<2x8x8x4xbf16>, vector<2x8x8x4xbf16>, vector<2x8x8x4xbf16>, vector<2x8x8x4xbf16> -> vector<2x8x8x36xbf16>
    %16 = vector.shape_cast %15 : vector<2x8x8x36xbf16> to vector<128x36xbf16>
    %c0_6 = arith.constant 0 : index
    %c0_7 = arith.constant 0 : index
    %17 = vector.load %arg2[%c0_6, %c0_7] : memref<36x8xbf16, #tpu.memory_space<vmem>>, vector<36x8xbf16>
    %cst_8 = arith.constant dense<0.000000e+00> : vector<128x8xf32>
    %18 = tpu.matmul %16, %17, %cst_8 {dimension_numbers = #tpu.dot_dimension_numbers<[1], [0], [0], [1], [0, 0, 1, 1], [], []>} : vector<128x36xbf16>, vector<36x8xbf16>, vector<128x8xf32> -> vector<128x8xf32>
    %19 = vector.shape_cast %18 : vector<128x8xf32> to vector<2x8x8x8xf32>
    %c0_9 = arith.constant 0 : index
    %c0_10 = arith.constant 0 : index
    %c0_11 = arith.constant 0 : index
    %c0_12 = arith.constant 0 : index
    %20 = vector.load %arg8[%c0_9, %c0_10, %c0_11, %c0_12] : memref<2x8x8x8xf32, #tpu.memory_space<vmem>>, vector<2x8x8x8xf32>
    tpu.vector_store %arg8[%c0_9, %c0_10, %c0_11, %c0_12], %19 {strides = array<i32>} : memref<2x8x8x8xf32, #tpu.memory_space<vmem>>, vector<2x8x8x8xf32>,
    %c0_13 = arith.constant 0 : index
    %c0_14 = arith.constant 0 : index
    %21 = vector.load %arg9[%c0_13, %c0_14] : memref<1x8xf32, #tpu.memory_space<vmem>>, vector<1x8xf32>
    %cst_15 = arith.constant dense<0.000000e+00> : vector<8xf32>
    %22 = vector.multi_reduction <add>, %18, %cst_15 [0] : vector<128x8xf32> to vector<8xf32>
    %23 = vector.shape_cast %22 : vector<8xf32> to vector<1x8xf32>
    %24 = arith.addf %21, %23 : vector<1x8xf32>
    %c0_16 = arith.constant 0 : index
    %c0_17 = arith.constant 0 : index
    %25 = vector.load %arg9[%c0_16, %c0_17] : memref<1x8xf32, #tpu.memory_space<vmem>>, vector<1x8xf32>
    tpu.vector_store %arg9[%c0_16, %c0_17], %24 {strides = array<i32>} : memref<1x8xf32, #tpu.memory_space<vmem>>, vector<1x8xf32>,
    %c0_18 = arith.constant 0 : index
    %c0_19 = arith.constant 0 : index
    %26 = vector.load %arg9[%c0_18, %c0_19] : memref<1x8xf32, #tpu.memory_space<vmem>>, vector<1x8xf32>
    %cst_20 = arith.constant 7.812500e-03 : f32
    %27 = vector.broadcast %cst_20 : f32 to vector<1x8xf32>
    %28 = arith.mulf %26, %27 : vector<1x8xf32>
    %c0_21 = arith.constant 0 : index
    %c0_22 = arith.constant 0 : index
    %c0_23 = arith.constant 0 : index
    %c0_24 = arith.constant 0 : index
    %29 = vector.load %arg8[%c0_21, %c0_22, %c0_23, %c0_24] : memref<2x8x8x8xf32, #tpu.memory_space<vmem>>, vector<2x8x8x8xf32>
    %30 = vector.shape_cast %29 : vector<2x8x8x8xf32> to vector<128x8xf32>
    %31 = vector.broadcast %28 : vector<1x8xf32> to vector<128x8xf32>
    %32 = arith.subf %30, %31 : vector<128x8xf32>
    %33 = arith.mulf %32, %32 : vector<128x8xf32>
    %cst_25 = arith.constant dense<0.000000e+00> : vector<8xf32>
    %34 = vector.multi_reduction <add>, %33, %cst_25 [0] : vector<128x8xf32> to vector<8xf32>
    %35 = vector.shape_cast %34 : vector<8xf32> to vector<1x8xf32>
    %cst_26 = arith.constant 7.812500e-03 : f32
    %36 = vector.broadcast %cst_26 : f32 to vector<1x8xf32>
    %37 = arith.mulf %35, %36 : vector<1x8xf32>
    %cst_27 = arith.constant 0.000000e+00 : f32
    %38 = vector.broadcast %cst_27 : f32 to vector<1x8xf32>
    %39 = arith.maximumf %37, %38 : vector<1x8xf32>
    %c0_28 = arith.constant 0 : index
    %c0_29 = arith.constant 0 : index
    %40 = vector.load %arg3[%c0_28, %c0_29] : memref<1x8xf32, #tpu.memory_space<vmem>>, vector<1x8xf32>
    %cst_30 = arith.constant 9.99999974E-6 : f32
    %41 = vector.broadcast %cst_30 : f32 to vector<1x8xf32>
    %42 = arith.addf %39, %41 : vector<1x8xf32>
    %43 = math.rsqrt %42 : vector<1x8xf32>
    %44 = arith.mulf %40, %43 : vector<1x8xf32>
    %45 = vector.broadcast %44 : vector<1x8xf32> to vector<128x8xf32>
    %46 = arith.mulf %32, %45 : vector<128x8xf32>
    %c0_31 = arith.constant 0 : index
    %c0_32 = arith.constant 0 : index
    %47 = vector.load %arg4[%c0_31, %c0_32] : memref<1x8xf32, #tpu.memory_space<vmem>>, vector<1x8xf32>
    %48 = vector.broadcast %47 : vector<1x8xf32> to vector<128x8xf32>
    %49 = arith.addf %46, %48 : vector<128x8xf32>
    %cst_33 = arith.constant 0.000000e+00 : f32
    %50 = vector.broadcast %cst_33 : f32 to vector<128x8xf32>
    %51 = arith.maximumf %49, %50 : vector<128x8xf32>
    %cst_34 = arith.constant 0.000000e+00 : bf16
    %52 = vector.broadcast %cst_34 : bf16 to vector<2x1x10x8xbf16>
    %c0_35 = arith.constant 0 : index
    %c0_36 = arith.constant 0 : index
    %c0_37 = arith.constant 0 : index
    %c0_38 = arith.constant 0 : index
    %53 = vector.load %arg5[%c0_35, %c0_36, %c0_37, %c0_38] : memref<2x10x10x8xbf16, #tpu.memory_space<vmem>>, vector<2x1x10x8xbf16>
    tpu.vector_store %arg5[%c0_35, %c0_36, %c0_37, %c0_38], %52 {strides = array<i32>} : memref<2x10x10x8xbf16, #tpu.memory_space<vmem>>, vector<2x1x10x8xbf16>,
    %cst_39 = arith.constant 0.000000e+00 : bf16
    %54 = vector.broadcast %cst_39 : bf16 to vector<2x1x10x8xbf16>
    %c0_40 = arith.constant 0 : index
    %c9 = arith.constant 9 : index
    %c0_41 = arith.constant 0 : index
    %c0_42 = arith.constant 0 : index
    %55 = vector.load %arg5[%c0_40, %c9, %c0_41, %c0_42] : memref<2x10x10x8xbf16, #tpu.memory_space<vmem>>, vector<2x1x10x8xbf16>
    tpu.vector_store %arg5[%c0_40, %c9, %c0_41, %c0_42], %54 {strides = array<i32>} : memref<2x10x10x8xbf16, #tpu.memory_space<vmem>>, vector<2x1x10x8xbf16>,
    %cst_43 = arith.constant 0.000000e+00 : bf16
    %56 = vector.broadcast %cst_43 : bf16 to vector<2x10x1x8xbf16>
    %c0_44 = arith.constant 0 : index
    %c0_45 = arith.constant 0 : index
    %c0_46 = arith.constant 0 : index
    %c0_47 = arith.constant 0 : index
    %57 = vector.load %arg5[%c0_44, %c0_45, %c0_46, %c0_47] : memref<2x10x10x8xbf16, #tpu.memory_space<vmem>>, vector<2x10x1x8xbf16>
    tpu.vector_store %arg5[%c0_44, %c0_45, %c0_46, %c0_47], %56 {strides = array<i32>} : memref<2x10x10x8xbf16, #tpu.memory_space<vmem>>, vector<2x10x1x8xbf16>,
    %cst_48 = arith.constant 0.000000e+00 : bf16
    %58 = vector.broadcast %cst_48 : bf16 to vector<2x10x1x8xbf16>
    %c0_49 = arith.constant 0 : index
    %c0_50 = arith.constant 0 : index
    %c9_51 = arith.constant 9 : index
    %c0_52 = arith.constant 0 : index
    %59 = vector.load %arg5[%c0_49, %c0_50, %c9_51, %c0_52] : memref<2x10x10x8xbf16, #tpu.memory_space<vmem>>, vector<2x10x1x8xbf16>
    tpu.vector_store %arg5[%c0_49, %c0_50, %c9_51, %c0_52], %58 {strides = array<i32>} : memref<2x10x10x8xbf16, #tpu.memory_space<vmem>>, vector<2x10x1x8xbf16>,
    %60 = vector.shape_cast %51 : vector<128x8xf32> to vector<2x8x8x8xf32>
    %61 = arith.truncf %60 : vector<2x8x8x8xf32> to vector<2x8x8x8xbf16>
    %c0_53 = arith.constant 0 : index
    %c1 = arith.constant 1 : index
    %c1_54 = arith.constant 1 : index
    %c0_55 = arith.constant 0 : index
    %62 = vector.load %arg5[%c0_53, %c1, %c1_54, %c0_55] : memref<2x10x10x8xbf16, #tpu.memory_space<vmem>>, vector<2x8x8x8xbf16>
    tpu.vector_store %arg5[%c0_53, %c1, %c1_54, %c0_55], %61 {strides = array<i32>} : memref<2x10x10x8xbf16, #tpu.memory_space<vmem>>, vector<2x8x8x8xbf16>,
    return
  }
  func.func @transform_1(%arg0: i32) -> (i32, i32) {
    %c0_i32 = arith.constant 0 : i32
    %c0_i32_0 = arith.constant 0 : i32
    return %c0_i32, %arg0 : i32, i32
  }
  func.func @transform_2(%arg0: i32) -> (i32, i32) {
    %c0_i32 = arith.constant 0 : i32
    %c0_i32_0 = arith.constant 0 : i32
    return %c0_i32, %arg0 : i32, i32
  }
  func.func @transform_3(%arg0: i32) -> (i32, i32) {
    %c0_i32 = arith.constant 0 : i32
    %c0_i32_0 = arith.constant 0 : i32
    return %c0_i32, %arg0 : i32, i32
  }
  func.func @transform_4(%arg0: i32) -> (i32, i32, i32, i32) {
    %c0_i32 = arith.constant 0 : i32
    %c0_i32_0 = arith.constant 0 : i32
    %c0_i32_1 = arith.constant 0 : i32
    %c0_i32_2 = arith.constant 0 : i32
    return %c0_i32, %c0_i32_0, %c0_i32_1, %arg0 : i32, i32, i32, i32
  }
}

</mosaic_0001>

<bundles_post_ra>
// kernel: tpu_custom_call.1
= control target key start
LH: loop header
LB: loop body
LE: loop exit
PB: predicated region body
PF: predicated region fallthrough
CT: control target
= control target key end

     0   :  { %s2696_s15 = smov [#allocation2]   ;;  %s4581_s0 = inlined_call_operand.hbm [shape: f32[2,8,2,8,8], index: 0, kind: input, shape index: {}]   ;;  %s4582_s1 = inlined_call_operand.vmem [shape: bf16[36,8], index: 1, kind: input, shape index: {}]   ;;  %s4583_s2 = inlined_call_operand.vmem [shape: f32[1,8], index: 2, kind: input, shape index: {}]   ;;  %s4584_s3 = inlined_call_operand.vmem [shape: f32[1,8], index: 3, kind: input, shape index: {}]   ;;  %s4585_s4 = inlined_call_operand.vmem [shape: bf16[2,10,10,8], index: 4, kind: output, shape index: {}]  }
   0x1   :  { %s27_s16 = sshll.u32 %s2696_s15, 4  ;;  %s2672_s19 = scalar_lea.hbm %s4581_s0, 4096  ;;  %s28_s16 = int_to_ptr.vmem [resolvable:$true] %s27_s16 }
   0x2   :  { %p2673_p0 = scmp.ne.s32.totalorder %s4581_s0, %s2672_s19  ;;  %p2676_p1 = scmp.lt.u32.totalorder %s2672_s19, %s4581_s0 }
   0x4   :  { %p2678_p2 = pnand %p2676_p1, %p2673_p0 }
   0x6   :  { %2681 = shalt.err (!%p2678_p2)  }
   0x7   :  { %s2682_s24 = scalar_lea.vmem %s28_s16, 4096  ;;  %p2687_p4 = scmp.lt.s32.totalorder %s28_s16, %s28_s16 }
   0x8   :  { %p2683_p3 = scmp.ne.s32.totalorder %s28_s16, %s2682_s24  ;;  %p2688_p5 = scmp.lt.s32.totalorder %s2682_s24, %s2682_s24 }
   0xa   :  { %p2689_p6 = por %p2688_p5, %p2687_p4 }
   0xc   :  { %p2690_p7 = pnand %p2689_p6, %p2683_p3 }
   0xe   :  { %2693 = shalt.err (!%p2690_p7)  }
   0xf   :  { %30 = dma.hbm_to_vmem [thread:$0]  %s4581_s0, 4096, %s28_s16, [#allocation6] }
  0x10   :  { %2694 = dma.done.wait [#allocation6], 4096 }
  0x11   :  { %2695 = vsyncadd [#allocation6], 4294963200  ;;  %v37_v0 = vld [vmem:[#allocation2] sm:$0xff]  ;;  %v38_v1 = vld [vmem:[#allocation2 + $0x8] sm:$0xff]  ;;  %vm165_vm0 = vcmask 27648   ;;  %vm167_vm1 = vcmask 24576  }
  0x12   :  { %v39_v2 = vld [vmem:[#allocation2 + $0x10] sm:$0xff]  ;;  %v40_v3 = vld [vmem:[#allocation2 + $0x18] sm:$0xff]  ;;  %v2745_v4 = vmax.f32 %v37_v0, %v38_v1  ;;  %v41_v5 = vld [vmem:[#allocation2 + $0x20] sm:$0xff]  ;;  %v4586_v7 = vmov 0   ;;  %vm1882_vm2 = vcmask 60416   ;;  %s2698_s8 = smov 124  }
  0x13   :  { %v42_v6 = vld [vmem:[#allocation2 + $0x28] sm:$0xff]  ;;  %166 = vst.msk [vmem:[#allocation3] sm:$0xf] %vm165_vm0, %v4586_v7  ;;  %169 = vst.msk [vmem:[#allocation3 + $0x50] sm:$0xf] %vm165_vm0, %v4586_v7  ;;  %v2755_v8 = vmax.f32 %v39_v2, %v40_v3  ;;  %v43_v9 = vld [vmem:[#allocation2 + $0x30] sm:$0xff] }
  0x14   :  { %172 = vst.msk [vmem:[#allocation3 + $0x48] sm:$0xf] %vm165_vm0, %v4586_v7  ;;  %174 = vst.msk [vmem:[#allocation3 + $0x98] sm:$0xf] %vm165_vm0, %v4586_v7  ;;  %v44_v10 = vld [vmem:[#allocation2 + $0x38] sm:$0xff]  ;;  %v2757_v11 = vmax.f32 %v41_v5, %v42_v6  ;;  %v45_v12 = vld [vmem:[#allocation2 + $0x40] sm:$0xff] }
  0x15   :  { %168 = vst.msk [vmem:[#allocation3 + $0x4] sm:$0x1] %vm167_vm1, %v4586_v7  ;;  %170 = vst.msk [vmem:[#allocation3 + $0x54] sm:$0x1] %vm167_vm1, %v4586_v7  ;;  %v2767_v13 = vmax.f32 %v43_v9, %v44_v10  ;;  %v46_v14 = vld [vmem:[#allocation2 + $0x48] sm:$0xff]  ;;  %v47_v15 = vld [vmem:[#allocation2 + $0x50] sm:$0xff]  ;;  %v2587_v17 = vpack.i.bf16 %v2755_v8, %v2745_v4 }
  0x16   :  { %173 = vst.msk [vmem:[#allocation3 + $0x4c] sm:$0x1] %vm167_vm1, %v4586_v7  ;;  %175 = vst.msk [vmem:[#allocation3 + $0x9c] sm:$0x1] %vm167_vm1, %v4586_v7  ;;  %v48_v16 = vld [vmem:[#allocation2 + $0x58] sm:$0xff]  ;;  %v2791_v18 = vmax.f32 %v45_v12, %v46_v14  ;;  %v49_v20 = vld [vmem:[#allocation2 + $0x60] sm:$0xff] }
  0x17   :  { %1883 = vst.msk [vmem:[%s4585_s4] sm:$0xf] %vm1882_vm2, %v4586_v7  ;;  %1885 = vst.msk [vmem:[%s4585_s4 + $0x50] sm:$0xf] %vm1882_vm2, %v4586_v7  ;;  %v2793_v19 = vmax.f32 %v47_v15, %v48_v16  ;;  %v50_v21 = vld [vmem:[#allocation2 + $0x68] sm:$0xff]  ;;  %v51_v22 = vld [vmem:[#allocation2 + $0x70] sm:$0xff]  ;;  %2588 = vrot.lane.b32.xlu0 %v2587_v17, %s2698_s8  ;;  %v2592_v27 = vpack.i.bf16 %v2767_v13, %v2757_v11 }
  0x18   :  { %2418 = vst.msk [vmem:[%s4585_s4 + $0x48] sm:$0xf] %vm1882_vm2, %v4586_v7  ;;  %2420 = vst.msk [vmem:[%s4585_s4 + $0x98] sm:$0xf] %vm1882_vm2, %v4586_v7  ;;  %vm177_vm3 = vsmask.f32 256  ;;  %v2795_v24 = vmax.f32 %v49_v20, %v50_v21 }
  0x19   :  { %v52_v23 = vld [vmem:[#allocation2 + $0x78] sm:$0xff]  ;;  %v53_v25 = vld [vmem:[#allocation2 + $0x80] sm:$0xff]  ;;  %v54_v26 = vld [vmem:[#allocation2 + $0x88] sm:$0xff]  ;;  %vm239_vm4 = vsmask.f32 7938  ;;  %v2597_v28 = vpack.i.bf16 %v2793_v19, %v2791_v18  ;;  %s2699_s9 = smov 8  }
  0x1a   :  { %v2802_v29 = vmax.f32 %v51_v22, %v52_v23  ;;  %v55_v30 = vld [vmem:[#allocation2 + $0x90] sm:$0xff]  ;;  %v56_v31 = vld [vmem:[#allocation2 + $0x98] sm:$0xff]  ;;  %v2804_v32 = vmax.f32 %v53_v25, %v54_v26  ;;  %v57_v33 = vld [vmem:[#allocation2 + $0xa0] sm:$0xff]  ;;  %s2700_s10 = smov 24   ;;  %s2701_s11 = smov 4   ;;  %vm1565_vm8 = vcmask 1041408  }
  0x1b   :  { %v2806_v34 = vmax.f32 %v55_v30, %v56_v31  ;;  %v58_v35 = vld [vmem:[#allocation2 + $0xa8] sm:$0xff]  ;;  %v59_v36 = vld [vmem:[#allocation2 + $0xb0] sm:$0xff]  ;;  %v60_v37 = vld [vmem:[#allocation2 + $0xb8] sm:$0xff]  ;;  %2598 = vrot.lane.b32.xlu1 %v2597_v28, %s2698_s8  ;;  %2593 = vrot.lane.b32.xlu0 %v2592_v27, %s2698_s8  ;;  %s2702_s12 = smov 32   ;;  %s2703_s13 = smov 28   ;;  %vm1200_vm9 = vcmask 31744  }
  0x1c   :  { %v2602_v38 = vpack.i.bf16 %v2802_v29, %v2795_v24  ;;  %v2811_v39 = vmax.f32 %v57_v33, %v58_v35  ;;  %v2813_v40 = vmax.f32 %v59_v36, %v60_v37  ;;  %vm2817_vm5 = vmand %vm167_vm1, %vm177_vm3  ;;  %v182_v42 = vld [vmem:[#allocation3 + $0x8] sm:$0x1]  ;;  %v185_v43 = vld [vmem:[#allocation3 + $0x10] sm:$0x1]  ;;  %s2704_s14 = smov 12   ;;  %s2705_s15 = smov 20  }
  0x1d   :  { %v183_v44 = vsel %vm2817_vm5, 0, %v182_v42  ;;  %v186_v45 = vsel %vm2817_vm5, 0, %v185_v43  ;;  %vm2827_vm6 = vmand %vm167_vm1, %vm239_vm4  ;;  %v244_v47 = vld [vmem:[#allocation3 + $0xc] sm:$0x1]  ;;  %v247_v48 = vld [vmem:[#allocation3 + $0x14] sm:$0x1]  ;;  %v2607_v49 = vpack.i.bf16 %v2806_v34, %v2804_v32 }
  0x1e   :  { %184 = vst [vmem:[#allocation3 + $0x8] sm:$0x1] %v183_v44  ;;  %187 = vst [vmem:[#allocation3 + $0x10] sm:$0x1] %v186_v45  ;;  %v245_v50 = vsel %vm2827_vm6, 0, %v244_v47  ;;  %v248_v51 = vsel %vm2827_vm6, 0, %v247_v48  ;;  %v2612_v52 = vpack.i.bf16 %v2813_v40, %v2811_v39 }
  0x1f   :  { %246 = vst [vmem:[#allocation3 + $0xc] sm:$0x1] %v245_v50  ;;  %249 = vst [vmem:[#allocation3 + $0x14] sm:$0x1] %v248_v51  ;;  %2603 = vrot.lane.b32.xlu1 %v2602_v38, %s2698_s8  ;;  %v61_v53 = vld [vmem:[#allocation2 + $0xc0] sm:$0xff]  ;;  %v62_v54 = vld [vmem:[#allocation2 + $0xc8] sm:$0xff]  ;;  %2608 = vrot.lane.b32.xlu0 %v2607_v49, %s2698_s8 }
  0x20   :  { %v63_v55 = vld [vmem:[#allocation2 + $0xd0] sm:$0xff]  ;;  %v64_v56 = vld [vmem:[#allocation2 + $0xd8] sm:$0xff]  ;;  %v2841_v57 = vmax.f32 %v61_v53, %v62_v54  ;;  %v65_v58 = vld [vmem:[#allocation2 + $0xe0] sm:$0xff]  ;;  %s2706_s20 = smov 16   ;;  %vm1249_vm10 = vcmask 64512   ;;  %vm1282_vm11 = vcmask 97280  }
  0x21   :  { %v66_v59 = vld [vmem:[#allocation2 + $0xe8] sm:$0xff]  ;;  %v2844_v60 = vmax.f32 %v63_v55, %v64_v56  ;;  %v67_v61 = vld [vmem:[#allocation2 + $0xf0] sm:$0xff]  ;;  %v68_v62 = vld [vmem:[#allocation2 + $0xf8] sm:$0xff]  ;;  %vm1315_vm12 = vcmask 130048   ;;  %vm1348_vm13 = vcmask 162816   ;;  %vm1381_vm14 = vcmask 195584  }
  0x22   :  { %v2846_v63 = vmax.f32 %v65_v58, %v66_v59  ;;  %v188_v0 = vld [vmem:[#allocation3 + $0x18] sm:$0x1]  ;;  %v2848_v1 = vmax.f32 %v67_v61, %v68_v62  ;;  %v191_v3 = vld [vmem:[#allocation3 + $0x20] sm:$0x1]  ;;  %v250_v5 = vld [vmem:[#allocation3 + $0x1c] sm:$0x1] }
  0x23   :  { %v189_v2 = vsel %vm2817_vm5, 0, %v188_v0  ;;  %2613 = vrot.lane.b32.xlu1 %v2612_v52, %s2698_s8  ;;  %v2617_v6 = vpack.i.bf16 %v2844_v60, %v2841_v57  ;;  %v192_v9 = vsel %vm2817_vm5, 0, %v191_v3  ;;  %v251_v10 = vsel %vm2827_vm6, 0, %v250_v5  ;;  %v253_v12 = vld [vmem:[#allocation3 + $0x24] sm:$0x1]  ;;  %vm2945_vm7 = vmand %vm165_vm0, %vm239_vm4 }
  0x24   :  { %190 = vst [vmem:[#allocation3 + $0x18] sm:$0x1] %v189_v2  ;;  %v179_v14 = vld [vmem:[#allocation3] sm:$0x1]  ;;  %v2622_v15 = vpack.i.bf16 %v2848_v1, %v2846_v63  ;;  %193 = vst [vmem:[#allocation3 + $0x20] sm:$0x1] %v192_v9 }
  0x25   :  { %252 = vst [vmem:[#allocation3 + $0x1c] sm:$0x1] %v251_v10  ;;  %v254_v16 = vsel %vm2827_vm6, 0, %v253_v12  ;;  %v180_v17 = vsel %vm2817_vm5, 0, %v179_v14  ;;  %2618 = vrot.lane.b32.xlu0 %v2617_v6, %s2698_s8  ;;  %v241_v20 = vld [vmem:[#allocation3 + $0x4] sm:$0x1] }
  0x26   :  { %255 = vst [vmem:[#allocation3 + $0x24] sm:$0x1] %v254_v16  ;;  %181 = vst [vmem:[#allocation3] sm:$0x1] %v180_v17  ;;  %v242_v21 = vsel %vm2827_vm6, 0, %v241_v20  ;;  %vm1414_vm15 = vcmask 228352  }
  0x27   :  { %v194_v22 = vld [vmem:[#allocation3 + $0x28] sm:$0x1]  ;;  %v197_v23 = vld [vmem:[#allocation3 + $0x30] sm:$0x1]  ;;  %2623 = vrot.lane.b32.xlu1 %v2622_v15, %s2698_s8  ;;  %243 = vst [vmem:[#allocation3 + $0x4] sm:$0x1] %v242_v21 }
  0x28   :  { %v195_v25 = vsel %vm2817_vm5, 0, %v194_v22  ;;  %v198_v26 = vsel %vm2817_vm5, 0, %v197_v23  ;;  %v256_v27 = vld [vmem:[#allocation3 + $0x2c] sm:$0x1]  ;;  %v259_v28 = vld [vmem:[#allocation3 + $0x34] sm:$0x1] }
  0x29   :  { %196 = vst [vmem:[#allocation3 + $0x28] sm:$0x1] %v195_v25  ;;  %199 = vst [vmem:[#allocation3 + $0x30] sm:$0x1] %v198_v26  ;;  %v257_v30 = vsel %vm2827_vm6, 0, %v256_v27  ;;  %v260_v31 = vsel %vm2827_vm6, 0, %v259_v28 }
  0x2a   :  { %v206_v33 = vld [vmem:[#allocation3 + $0x48] sm:$0x1]  ;;  %v268_v35 = vld [vmem:[#allocation3 + $0x4c] sm:$0x1]  ;;  %258 = vst [vmem:[#allocation3 + $0x2c] sm:$0x1] %v257_v30 }
  0x2b   :  { %261 = vst [vmem:[#allocation3 + $0x34] sm:$0x1] %v260_v31  ;;  %v207_v36 = vsel %vm2817_vm5, 0, %v206_v33  ;;  %v269_v37 = vsel %vm2827_vm6, 0, %v268_v35  ;;  %v200_v38 = vld [vmem:[#allocation3 + $0x38] sm:$0x1] }
  0x2c   :  { %v203_v42 = vld [vmem:[#allocation3 + $0x40] sm:$0x1]  ;;  %208 = vst [vmem:[#allocation3 + $0x48] sm:$0x1] %v207_v36  ;;  %270 = vst [vmem:[#allocation3 + $0x4c] sm:$0x1] %v269_v37 }
  0x2d   :  { %v201_v43 = vsel %vm2817_vm5, 0, %v200_v38  ;;  %v204_v44 = vsel %vm2817_vm5, 0, %v203_v42  ;;  %v262_v45 = vld [vmem:[#allocation3 + $0x3c] sm:$0x1]  ;;  %v626_v48 = vld [vmem:[#allocation3] sm:$0xf] }
  0x2e   :  { %202 = vst [vmem:[#allocation3 + $0x38] sm:$0x1] %v201_v43  ;;  %205 = vst [vmem:[#allocation3 + $0x40] sm:$0x1] %v204_v44  ;;  %v263_v47 = vsel %vm2827_vm6, 0, %v262_v45  ;;  %vm1447_vm0 = vcmask 261120  }
  0x2f   :  { %264 = vst [vmem:[#allocation3 + $0x3c] sm:$0x1] %v263_v47  ;;  %v265_v49 = vld [vmem:[#allocation3 + $0x44] sm:$0x1]  ;;  %v209_v51 = vld [vmem:[#allocation3 + $0x50] sm:$0x1] }
  0x30   :  { %v266_v50 = vsel %vm2827_vm6, 0, %v265_v49  ;;  %v271_v52 = vld [vmem:[#allocation3 + $0x54] sm:$0x1]  ;;  %v627_v53 = vld [vmem:[#allocation3 + $0x4] sm:$0x1]  ;;  %v210_v54 = vsel %vm2817_vm5, 0, %v209_v51 }
  0x31   :  { %267 = vst [vmem:[#allocation3 + $0x44] sm:$0x1] %v266_v50  ;;  %v272_v55 = vsel %vm2827_vm6, 0, %v271_v52  ;;  %v2360_v56 = vcombine.low %v626_v48, %v627_v53  ;;  %211 = vst [vmem:[#allocation3 + $0x50] sm:$0x1] %v210_v54  ;;  %vm1540_vm1 = vcmask 293888  }
  0x32   :  { %273 = vst [vmem:[#allocation3 + $0x54] sm:$0x1] %v272_v55  ;;  %v212_v26 = vld [vmem:[#allocation3 + $0x58] sm:$0x1]  ;;  %v215_v27 = vld [vmem:[#allocation3 + $0x60] sm:$0x1] }
  0x33   :  { %v890_v58 = vrot.slane %v2360_v56, 1  ;;  %v747_v59 = vshrl.u32 %v2360_v56, 16  ;;  %v749_v61 = vshll.u32 %v2360_v56, 16  ;;  %v644_v62 = vld [vmem:[#allocation3 + $0x48] sm:$0xf]  ;;  %v213_v30 = vsel %vm2817_vm5, 0, %v212_v26 }
  0x34   :  { %v645_v0 = vld [vmem:[#allocation3 + $0x4c] sm:$0x1]  ;;  %v2394_v2 = vcombine.low %v644_v62, %v644_v62  ;;  %v274_v28 = vld [vmem:[#allocation3 + $0x5c] sm:$0x1]  ;;  %v216_v31 = vsel %vm2817_vm5, 0, %v215_v27 }
  0x35   :  { %906 = vrot.lane.b32.xlu0 %v890_v58, %s2699_s9  ;;  %v751_v3 = vrot.slane %v749_v61, 1  ;;  %v2396_v5 = vcombine.low %v644_v62, %v645_v0  ;;  %v275_v33 = vsel %vm2827_vm6, 0, %v274_v28  ;;  %v277_v35 = vld [vmem:[#allocation3 + $0x64] sm:$0x1]  ;;  %214 = vst [vmem:[#allocation3 + $0x58] sm:$0x1] %v213_v30 }
  0x36   :  { %1096 = vrot.lane.b32.xlu1 %v2394_v2, %s2700_s10  ;;  %217 = vst [vmem:[#allocation3 + $0x60] sm:$0x1] %v216_v31  ;;  %276 = vst [vmem:[#allocation3 + $0x5c] sm:$0x1] %v275_v33  ;;  %v278_v36 = vsel %vm2827_vm6, 0, %v277_v35 }
  0x37   :  { %v752_v6 = vor.u32 %v751_v3, %v747_v59  ;;  %v1166_v9 = vrot.slane %v2396_v5, 1  ;;  %v1121_v10 = vshrl.u32 %v2396_v5, 16  ;;  %v1123_v12 = vshll.u32 %v2396_v5, 16  ;;  %279 = vst [vmem:[#allocation3 + $0x64] sm:$0x1] %v278_v36 }
  0x38   :  { %v646_v14 = vld [vmem:[#allocation3 + $0x50] sm:$0xf]  ;;  %v218_v37 = vld [vmem:[#allocation3 + $0x68] sm:$0x1]  ;;  %v280_v42 = vld [vmem:[#allocation3 + $0x6c] sm:$0x1] }
  0x39   :  { %v647_v15 = vld [vmem:[#allocation3 + $0x54] sm:$0x1]  ;;  %858 = vrot.lane.b32.xlu0 %v752_v6, %s2701_s11  ;;  %v1125_v16 = vrot.slane %v1123_v12, 1  ;;  %v221_v38 = vld [vmem:[#allocation3 + $0x70] sm:$0x1]  ;;  %v219_v43 = vsel %vm2817_vm5, 0, %v218_v37 }
  0x3a   :  { %v2896_v17 = vcombine.low %v646_v14, %v647_v15  ;;  %1182 = vrot.lane.b32.xlu1 %v1166_v9, %s2702_s12  ;;  %v222_v44 = vsel %vm2817_vm5, 0, %v221_v38  ;;  %v281_v45 = vsel %vm2827_vm6, 0, %v280_v42  ;;  %v283_v47 = vld [vmem:[#allocation3 + $0x74] sm:$0x1]  ;;  %220 = vst [vmem:[#allocation3 + $0x68] sm:$0x1] %v219_v43 }
  0x3b   :  { %v1126_v20 = vor.u32 %v1125_v16, %v1121_v10  ;;  %223 = vst [vmem:[#allocation3 + $0x70] sm:$0x1] %v222_v44  ;;  %282 = vst [vmem:[#allocation3 + $0x6c] sm:$0x1] %v281_v45  ;;  %v284_v48 = vsel %vm2827_vm6, 0, %v283_v47 }
  0x3c   :  { %v803_v21 = vshrl.u32 %v2896_v17, 16  ;;  %v805_v22 = vshll.u32 %v2896_v17, 16  ;;  %285 = vst [vmem:[#allocation3 + $0x74] sm:$0x1] %v284_v48  ;;  %v224_v49 = vld [vmem:[#allocation3 + $0x78] sm:$0x1] }
  0x3d   :  { %v227_v50 = vld [vmem:[#allocation3 + $0x80] sm:$0x1]  ;;  %v286_v51 = vld [vmem:[#allocation3 + $0x7c] sm:$0x1]  ;;  %v225_v52 = vsel %vm2817_vm5, 0, %v224_v49 }
  0x3e   :  { %v807_v23 = vrot.slane %v805_v22, 1  ;;  %1148 = vrot.lane.b32.xlu1 %v1126_v20, %s2703_s13  ;;  %v228_v53 = vsel %vm2817_vm5, 0, %v227_v50  ;;  %v287_v54 = vsel %vm2827_vm6, 0, %v286_v51  ;;  %226 = vst [vmem:[#allocation3 + $0x78] sm:$0x1] %v225_v52 }
  0x3f   :  { %229 = vst [vmem:[#allocation3 + $0x80] sm:$0x1] %v228_v53  ;;  %288 = vst [vmem:[#allocation3 + $0x7c] sm:$0x1] %v287_v54  ;;  %v289_v55 = vld [vmem:[#allocation3 + $0x84] sm:$0x1] }
  0x40   :  { %v808_v25 = vor.u32 %v807_v23, %v803_v21  ;;  %v230_v56 = vld [vmem:[#allocation3 + $0x88] sm:$0x1]  ;;  %v233_v58 = vld [vmem:[#allocation3 + $0x90] sm:$0x1]  ;;  %v290_v59 = vsel %vm2827_vm6, 0, %v289_v55 }
  0x41   :  { %v231_v61 = vsel %vm2817_vm5, 0, %v230_v56  ;;  %v234_v62 = vsel %vm2817_vm5, 0, %v233_v58  ;;  %v292_v0 = vld [vmem:[#allocation3 + $0x8c] sm:$0x1]  ;;  %291 = vst [vmem:[#allocation3 + $0x84] sm:$0x1] %v290_v59 }
  0x42   :  { %874 = vrot.lane.b32.xlu0 %v808_v25, %s2701_s11  ;;  %232 = vst [vmem:[#allocation3 + $0x88] sm:$0x1] %v231_v61  ;;  %235 = vst [vmem:[#allocation3 + $0x90] sm:$0x1] %v234_v62  ;;  %v293_v2 = vsel %vm2827_vm6, 0, %v292_v0 }
  0x43   :  { %v295_v3 = vld [vmem:[#allocation3 + $0x94] sm:$0x1]  ;;  %294 = vst [vmem:[#allocation3 + $0x8c] sm:$0x1] %v293_v2  ;;  %v528_v42 = vld [vmem:[#allocation3 + $0x8] sm:$0xf] }
  0x44   :  { %v296_v5 = vsel %vm2827_vm6, 0, %v295_v3  ;;  %v534_v43 = vld [vmem:[#allocation3 + $0x10] sm:$0xf]  ;;  %v531_v48 = vld [vmem:[#allocation3 + $0xc] sm:$0x1] }
  0x45   :  { %297 = vst [vmem:[#allocation3 + $0x94] sm:$0x1] %v296_v5  ;;  %v537_v49 = vld [vmem:[#allocation3 + $0x14] sm:$0x1]  ;;  %v540_v5 = vld [vmem:[#allocation3 + $0x18] sm:$0xf] }
  0x89   :  { %v2589_v6 = vpop.permute.xlu0 %2588 }
  0x8a   :  { %v2591_v9 = vunpack.i.h.bf16 %v2589_v6  ;;  %v2590_v10 = vunpack.i.l.bf16 %v2589_v6  ;;  %v543_v6 = vld [vmem:[#allocation3 + $0x1c] sm:$0x1] }
  0x8c   :  { %v150_v14 = vmax.f32 %v2755_v8, %v2591_v9  ;;  %v149_v15 = vmax.f32 %v2745_v4, %v2590_v10 }
  0x8d   :  { %v2599_v12 = vpop.permute.xlu1 %2598  ;;  %v2594_v21 = vpop.permute.xlu0 %2593 }
  0x8e   :  { %v2601_v16 = vunpack.i.h.bf16 %v2599_v12  ;;  %v2600_v20 = vunpack.i.l.bf16 %v2599_v12  ;;  %v2503_v22 = vpack.c.bf16 %v150_v14, %v150_v14  ;;  %v2502_v23 = vpack.c.bf16 %v149_v15, %v149_v15  ;;  %v546_v15 = vld [vmem:[#allocation3 + $0x20] sm:$0xf] }
  0x8f   :  { %v2596_v25 = vunpack.i.h.bf16 %v2594_v21  ;;  %v2595_v26 = vunpack.i.l.bf16 %v2594_v21 }
  0x90   :  { %v154_v27 = vmax.f32 %v2793_v19, %v2601_v16  ;;  %v153_v28 = vmax.f32 %v2791_v18, %v2600_v20  ;;  %v374_v31 = vshrl.u32 %v2503_v22, 16  ;;  %v377_v33 = vshll.u32 %v2503_v22, 16  ;;  %v549_v16 = vld [vmem:[#allocation3 + $0x24] sm:$0x1] }
  0x91   :  { %v2604_v30 = vpop.permute.xlu1 %2603  ;;  %v366_v35 = vshrl.u32 %v2502_v23, 16  ;;  %v369_v36 = vshll.u32 %v2502_v23, 16  ;;  %v152_v8 = vmax.f32 %v2767_v13, %v2596_v25  ;;  %v151_v4 = vmax.f32 %v2757_v11, %v2595_v26 }
  0x92   :  { %v2507_v37 = vpack.c.bf16 %v154_v27, %v154_v27  ;;  %v2941_v38 = vpack.c.bf16 %v153_v28, %v153_v28  ;;  %v376_v44 = vrot.slane %v374_v31, 7  ;;  %v2606_v47 = vunpack.i.h.bf16 %v2604_v30  ;;  %v558_v28 = vld [vmem:[#allocation3 + $0x30] sm:$0xf] }
  0x93   :  { %v368_v45 = vrot.slane %v366_v35, 7  ;;  %v2605_v19 = vunpack.i.l.bf16 %v2604_v30  ;;  %v2505_v13 = vpack.c.bf16 %v152_v8, %v152_v8  ;;  %v2504_v50 = vpack.c.bf16 %v151_v4, %v151_v4  ;;  %v561_v30 = vld [vmem:[#allocation3 + $0x34] sm:$0x1]  ;;  %v2609_v8 = vpop.permute.xlu0 %2608 }
  0x94   :  { %v406_v11 = vshrl.u32 %v2507_v37, 16  ;;  %v409_v51 = vshll.u32 %v2507_v37, 16  ;;  %v379_v52 = vor.u32 %v377_v33, %v376_v44  ;;  %v380_v53 = vrot.slane %v376_v44, 4 }
  0x95   :  { %v371_v54 = vor.u32 %v369_v36, %v368_v45  ;;  %v372_v55 = vrot.slane %v368_v45, 4  ;;  %v390_v56 = vshrl.u32 %v2505_v13, 16  ;;  %v393_v58 = vshll.u32 %v2505_v13, 16 }
  0x96   :  { %v382_v59 = vshrl.u32 %v2504_v50, 16  ;;  %v385_v61 = vshll.u32 %v2504_v50, 16  ;;  %v535_v62 = vsel %vm2945_vm7, %v379_v52, %v534_v43  ;;  %v538_v0 = vsel %vm2817_vm5, %v380_v53, %v537_v49 }
  0x97   :  { %v529_v2 = vsel %vm2945_vm7, %v371_v54, %v528_v42  ;;  %v532_v3 = vsel %vm2817_vm5, %v372_v55, %v531_v48  ;;  %536 = vst [vmem:[#allocation3 + $0x10] sm:$0xf] %v535_v62  ;;  %539 = vst [vmem:[#allocation3 + $0x14] sm:$0x1] %v538_v0  ;;  %v392_v9 = vrot.slane %v390_v56, 7  ;;  %v408_v12 = vrot.slane %v406_v11, 7 }
  0x98   :  { %530 = vst [vmem:[#allocation3 + $0x8] sm:$0xf] %v529_v2  ;;  %533 = vst [vmem:[#allocation3 + $0xc] sm:$0x1] %v532_v3  ;;  %v384_v10 = vrot.slane %v382_v59, 7  ;;  %v398_v14 = vshrl.u32 %v2941_v38, 16  ;;  %v156_v21 = vmax.f32 %v2802_v29, %v2606_v47  ;;  %v155_v22 = vmax.f32 %v2795_v24, %v2605_v19  ;;  %v2983_v59 = vpop.permute.xlu1 %2613 }
  0x99   :  { %v401_v20 = vshll.u32 %v2941_v38, 16  ;;  %v395_v23 = vor.u32 %v393_v58, %v392_v9  ;;  %v396_v25 = vrot.slane %v392_v9, 4  ;;  %v411_v31 = vor.u32 %v409_v51, %v408_v12  ;;  %v552_v38 = vld [vmem:[#allocation3 + $0x28] sm:$0xf]  ;;  %v555_v42 = vld [vmem:[#allocation3 + $0x2c] sm:$0x1] }
  0x9a   :  { %v387_v26 = vor.u32 %v385_v61, %v384_v10  ;;  %v388_v27 = vrot.slane %v384_v10, 4  ;;  %v412_v33 = vrot.slane %v408_v12, 4  ;;  %v400_v35 = vrot.slane %v398_v14, 7  ;;  %v570_v61 = vld [vmem:[#allocation3 + $0x40] sm:$0xf] }
  0x9b   :  { %v2509_v36 = vpack.c.bf16 %v156_v21, %v156_v21  ;;  %v547_v4 = vsel %vm2945_vm7, %v395_v23, %v546_v15  ;;  %v550_v37 = vsel %vm2817_vm5, %v396_v25, %v549_v16  ;;  %v559_v43 = vsel %vm2945_vm7, %v411_v31, %v558_v28  ;;  %v573_v62 = vld [vmem:[#allocation3 + $0x44] sm:$0x1]  ;;  %v564_v9 = vld [vmem:[#allocation3 + $0x38] sm:$0xf]  ;;  %v567_v10 = vld [vmem:[#allocation3 + $0x3c] sm:$0x1] }
  0x9c   :  { %v541_v24 = vsel %vm2945_vm7, %v387_v26, %v540_v5  ;;  %v544_v29 = vsel %vm2817_vm5, %v388_v27, %v543_v6  ;;  %548 = vst [vmem:[#allocation3 + $0x20] sm:$0xf] %v547_v4  ;;  %551 = vst [vmem:[#allocation3 + $0x24] sm:$0x1] %v550_v37  ;;  %v562_v44 = vsel %vm2817_vm5, %v412_v33, %v561_v30  ;;  %v404_v47 = vrot.slane %v400_v35, 4 }
  0x9d   :  { %542 = vst [vmem:[#allocation3 + $0x18] sm:$0xf] %v541_v24  ;;  %545 = vst [vmem:[#allocation3 + $0x1c] sm:$0x1] %v544_v29  ;;  %v403_v45 = vor.u32 %v401_v20, %v400_v35  ;;  %v422_v19 = vshrl.u32 %v2509_v36, 16  ;;  %v425_v48 = vshll.u32 %v2509_v36, 16  ;;  %v2508_v49 = vpack.c.bf16 %v155_v22, %v155_v22 }
  0x9e   :  { %560 = vst [vmem:[#allocation3 + $0x30] sm:$0xf] %v559_v43  ;;  %563 = vst [vmem:[#allocation3 + $0x34] sm:$0x1] %v562_v44  ;;  %v2611_v13 = vunpack.i.h.bf16 %v2609_v8  ;;  %v556_v11 = vsel %vm2817_vm5, %v404_v47, %v555_v42  ;;  %v2977_v51 = vld [vmem:[#allocation3 + $0x10] sm:$0xf]  ;;  %v2610_v53 = vunpack.i.l.bf16 %v2609_v8  ;;  %v2616_v14 = vunpack.i.h.bf16 %v2983_v59 }
  0x9f   :  { %v553_v50 = vsel %vm2945_vm7, %v403_v45, %v552_v38  ;;  %v2979_v52 = vld [vmem:[#allocation3 + $0x8] sm:$0xf]  ;;  %557 = vst [vmem:[#allocation3 + $0x2c] sm:$0x1] %v556_v11  ;;  %v424_v54 = vrot.slane %v422_v19, 7  ;;  %v414_v55 = vshrl.u32 %v2508_v49, 16  ;;  %v2377_v58 = vcombine.low %v2977_v51, %v2977_v51 }
  0xa0   :  { %554 = vst [vmem:[#allocation3 + $0x28] sm:$0xf] %v553_v50  ;;  %v417_v56 = vshll.u32 %v2508_v49, 16  ;;  %v2376_v0 = vcombine.low %v2979_v52, %v2979_v52  ;;  %v158_v6 = vmax.f32 %v2806_v34, %v2611_v13  ;;  %v157_v12 = vmax.f32 %v2804_v32, %v2610_v53  ;;  %v582_v29 = vld [vmem:[#allocation3 + $0x60] sm:$0xf]  ;;  %v2619_v53 = vpop.permute.xlu0 %2618 }
  0xa1   :  { %v427_v2 = vor.u32 %v425_v48, %v424_v54  ;;  %v428_v3 = vrot.slane %v424_v54, 4  ;;  %v416_v5 = vrot.slane %v414_v55, 7  ;;  %960 = vrot.lane.b32.xlu1 %v2377_v58, %s2704_s14  ;;  %v160_v30 = vmax.f32 %v2813_v40, %v2616_v14  ;;  %v585_v38 = vld [vmem:[#allocation3 + $0x64] sm:$0x1]  ;;  %v576_v43 = vld [vmem:[#allocation3 + $0x58] sm:$0xf] }
  0xa2   :  { %958 = vrot.lane.b32.xlu0 %v2376_v0, %s2704_s14  ;;  %v2511_v27 = vpack.c.bf16 %v158_v6, %v158_v6  ;;  %v2510_v28 = vpack.c.bf16 %v157_v12, %v157_v12  ;;  %v629_v47 = vld [vmem:[#allocation3 + $0xc] sm:$0x1]  ;;  %v579_v19 = vld [vmem:[#allocation3 + $0x5c] sm:$0x1]  ;;  %v2615_v6 = vunpack.i.l.bf16 %v2983_v59  ;;  %v2621_v14 = vunpack.i.h.bf16 %v2619_v53 }
  0xa3   :  { %v571_v15 = vsel %vm2945_vm7, %v427_v2, %v570_v61  ;;  %v574_v16 = vsel %vm2817_vm5, %v428_v3, %v573_v62  ;;  %v419_v20 = vor.u32 %v417_v56, %v416_v5  ;;  %v420_v21 = vrot.slane %v416_v5, 4  ;;  %v2996_v22 = vld [vmem:[#allocation3 + $0x20] sm:$0xf]  ;;  %v2624_v61 = vpop.permute.xlu1 %2623  ;;  %v594_v3 = vld [vmem:[#allocation3 + $0x70] sm:$0xf] }
  0xa4   :  { %v2998_v23 = vld [vmem:[#allocation3 + $0x18] sm:$0xf]  ;;  %572 = vst [vmem:[#allocation3 + $0x40] sm:$0xf] %v571_v15  ;;  %575 = vst [vmem:[#allocation3 + $0x44] sm:$0x1] %v574_v16  ;;  %v2379_v34 = vcombine.low %v2996_v22, %v2996_v22  ;;  %v2513_v37 = vpack.c.bf16 %v160_v30, %v160_v30  ;;  %v3032_v0 = vcombine.low %v2979_v52, %v629_v47  ;;  %v2625_v59 = vunpack.i.l.bf16 %v2624_v61 }
  0xa5   :  { %v2378_v32 = vcombine.low %v2998_v23, %v2998_v23  ;;  %v565_v25 = vsel %vm2945_vm7, %v419_v20, %v564_v9  ;;  %v568_v26 = vsel %vm2817_vm5, %v420_v21, %v567_v10  ;;  %v438_v31 = vshrl.u32 %v2511_v27, 16  ;;  %v3019_v49 = vld [vmem:[#allocation3 + $0x30] sm:$0xf]  ;;  %v597_v5 = vld [vmem:[#allocation3 + $0x74] sm:$0x1] }
  0xa6   :  { %566 = vst [vmem:[#allocation3 + $0x38] sm:$0xf] %v565_v25  ;;  %569 = vst [vmem:[#allocation3 + $0x3c] sm:$0x1] %v568_v26  ;;  %964 = vrot.lane.b32.xlu1 %v2379_v34, %s2704_s14  ;;  %v441_v33 = vshll.u32 %v2511_v27, 16  ;;  %v430_v35 = vshrl.u32 %v2510_v28, 16  ;;  %v2381_v54 = vcombine.low %v3019_v49, %v3019_v49  ;;  %v159_v20 = vmax.f32 %v2811_v39, %v2615_v6 }
  0xa7   :  { %962 = vrot.lane.b32.xlu0 %v2378_v32, %s2704_s14  ;;  %v433_v36 = vshll.u32 %v2510_v28, 16  ;;  %v3013_v8 = vld [vmem:[#allocation3 + $0x28] sm:$0xf]  ;;  %v440_v4 = vrot.slane %v438_v31, 7  ;;  %v454_v45 = vshrl.u32 %v2513_v37, 16  ;;  %v2620_v21 = vunpack.i.l.bf16 %v2619_v53 }
  0xa8   :  { %v2380_v24 = vcombine.low %v3013_v8, %v3013_v8  ;;  %v432_v42 = vrot.slane %v430_v35, 7  ;;  %v631_v16 = vld [vmem:[#allocation3 + $0x14] sm:$0x1]  ;;  %v162_v27 = vmax.f32 %v2844_v60, %v2621_v14  ;;  %v2512_v28 = vpack.c.bf16 %v159_v20, %v159_v20  ;;  %v606_v47 = vld [vmem:[#allocation3 + $0x80] sm:$0xf] }
  0xa9   :  { %v443_v40 = vor.u32 %v441_v33, %v440_v4  ;;  %v444_v44 = vrot.slane %v440_v4, 4  ;;  %v456_v56 = vrot.slane %v454_v45, 7  ;;  %v161_v30 = vmax.f32 %v2841_v57, %v2620_v21  ;;  %v588_v57 = vld [vmem:[#allocation3 + $0x68] sm:$0xf]  ;;  %v618_v20 = vld [vmem:[#allocation3 + $0x90] sm:$0xf] }
  0xaa   :  { %1084 = vrot.lane.b32.xlu1 %v2378_v32, %s2700_s10  ;;  %v435_v48 = vor.u32 %v433_v36, %v432_v42  ;;  %v436_v11 = vrot.slane %v432_v42, 4  ;;  %v163_v31 = vmax.f32 %v2846_v63, %v2625_v59  ;;  %v3060_v33 = vcombine.low %v2977_v51, %v631_v16  ;;  %v633_v42 = vld [vmem:[#allocation3 + $0x1c] sm:$0x1]  ;;  %v621_v21 = vld [vmem:[#allocation3 + $0x94] sm:$0x1] }
  0xab   :  { %1082 = vrot.lane.b32.xlu0 %v2377_v58, %s2700_s10  ;;  %v583_v13 = vsel %vm2945_vm7, %v443_v40, %v582_v29  ;;  %v586_v50 = vsel %vm2817_vm5, %v444_v44, %v585_v38  ;;  %v457_v58 = vshll.u32 %v2513_v37, 16  ;;  %v3029_v62 = vld [vmem:[#allocation3 + $0x40] sm:$0xf]  ;;  %v460_v12 = vrot.slane %v456_v56, 4  ;;  %v591_v29 = vld [vmem:[#allocation3 + $0x6c] sm:$0x1] }
  0xac   :  { %584 = vst [vmem:[#allocation3 + $0x60] sm:$0xf] %v583_v13  ;;  %587 = vst [vmem:[#allocation3 + $0x64] sm:$0x1] %v586_v50  ;;  %v577_v55 = vsel %vm2945_vm7, %v435_v48, %v576_v43  ;;  %v580_v2 = vsel %vm2817_vm5, %v436_v11, %v579_v19  ;;  %v3041_v9 = vcombine.low %v3029_v62, %v3029_v62  ;;  %v446_v36 = vshrl.u32 %v2512_v28, 16 }
  0xad   :  { %578 = vst [vmem:[#allocation3 + $0x58] sm:$0xf] %v577_v55  ;;  %581 = vst [vmem:[#allocation3 + $0x5c] sm:$0x1] %v580_v2  ;;  %v459_v10 = vor.u32 %v457_v58, %v456_v56  ;;  %v3043_v15 = vld [vmem:[#allocation3 + $0x38] sm:$0xf]  ;;  %v598_v26 = vsel %vm2817_vm5, %v460_v12, %v597_v5  ;;  %v2515_v35 = vpack.c.bf16 %v162_v27, %v162_v27 }
  0xae   :  { %1088 = vrot.lane.b32.xlu1 %v2380_v24, %s2700_s10  ;;  %v2382_v32 = vcombine.low %v3043_v15, %v3043_v15  ;;  %599 = vst [vmem:[#allocation3 + $0x74] sm:$0x1] %v598_v26  ;;  %v449_v60 = vshll.u32 %v2512_v28, 16  ;;  %v2514_v4 = vpack.c.bf16 %v161_v30, %v161_v30  ;;  %v2516_v63 = vpack.c.bf16 %v163_v31, %v163_v31  ;;  %v609_v55 = vld [vmem:[#allocation3 + $0x84] sm:$0x1] }
  0xaf   :  { %1086 = vrot.lane.b32.xlu0 %v2379_v34, %s2700_s10  ;;  %v2626_v34 = vunpack.i.h.bf16 %v2624_v61  ;;  %v595_v25 = vsel %vm2945_vm7, %v459_v10, %v594_v3  ;;  %v473_v38 = vshll.u32 %v2515_v35, 16  ;;  %v448_v43 = vrot.slane %v446_v36, 7  ;;  %v600_v2 = vld [vmem:[#allocation3 + $0x78] sm:$0xf]  ;;  %v603_v3 = vld [vmem:[#allocation3 + $0x7c] sm:$0x1] }
  0xb0   :  { %596 = vst [vmem:[#allocation3 + $0x70] sm:$0xf] %v595_v25  ;;  %v462_v40 = vshrl.u32 %v2514_v4, 16  ;;  %v465_v44 = vshll.u32 %v2514_v4, 16  ;;  %v478_v13 = vshrl.u32 %v2516_v63, 16  ;;  %v481_v50 = vshll.u32 %v2516_v63, 16 }
  0xb1   :  { %v164_v39 = vmax.f32 %v2848_v1, %v2626_v34  ;;  %v470_v1 = vshrl.u32 %v2515_v35, 16  ;;  %v451_v11 = vor.u32 %v449_v60, %v448_v43  ;;  %v452_v53 = vrot.slane %v448_v43, 4  ;;  %v615_v25 = vld [vmem:[#allocation3 + $0x8c] sm:$0x1]  ;;  %v635_v4 = vld [vmem:[#allocation3 + $0x24] sm:$0x1] }
  0xb2   :  { %968 = vrot.lane.b32.xlu1 %v2381_v54, %s2704_s14  ;;  %v464_v56 = vrot.slane %v462_v40, 7  ;;  %v3066_v61 = vcombine.low %v2998_v23, %v633_v42  ;;  %v480_v10 = vrot.slane %v478_v13, 7  ;;  %v892_v31 = vrot.slane %v3060_v33, 1  ;;  %v641_v42 = vld [vmem:[#allocation3 + $0x3c] sm:$0x1] }
  0xb3   :  { %966 = vrot.lane.b32.xlu0 %v2380_v24, %s2704_s14  ;;  %v2517_v37 = vpack.c.bf16 %v164_v39, %v164_v39  ;;  %v891_v24 = vrot.slane %v3032_v0, 1  ;;  %v472_v19 = vrot.slane %v470_v1, 7  ;;  %v592_v12 = vsel %vm2817_vm5, %v452_v53, %v591_v29  ;;  %v637_v1 = vld [vmem:[#allocation3 + $0x2c] sm:$0x1]  ;;  %v651_v46 = vld [vmem:[#allocation3 + $0x64] sm:$0x1] }
  0xb4   :  { %v467_v14 = vor.u32 %v465_v44, %v464_v56  ;;  %v468_v16 = vrot.slane %v464_v56, 4  ;;  %593 = vst [vmem:[#allocation3 + $0x6c] sm:$0x1] %v592_v12  ;;  %v483_v30 = vor.u32 %v481_v50, %v480_v10  ;;  %v484_v39 = vrot.slane %v480_v10, 4 }
  0xb5   :  { %v486_v45 = vshrl.u32 %v2517_v37, 16  ;;  %v489_v48 = vshll.u32 %v2517_v37, 16  ;;  %v475_v5 = vor.u32 %v473_v38, %v472_v19  ;;  %v476_v6 = vrot.slane %v472_v19, 4  ;;  %v2665_v12 = vld [vmem:[%s4582_s1 + $0x10] ss:$0 sps:$4 sm:$0x33]  }
  0xb6   :  { %972 = vrot.lane.b32.xlu1 %v3041_v9, %s2704_s14  ;;  %v604_v28 = vsel %vm2817_vm5, %v468_v16, %v603_v3  ;;  %v893_v35 = vrot.slane %v3066_v61, 1  ;;  %v3098_v29 = vcombine.low %v2996_v22, %v635_v4  ;;  %v3110_v38 = vcombine.low %v3013_v8, %v637_v1 }
  0xb7   :  { %970 = vrot.lane.b32.xlu0 %v2382_v32, %s2704_s14  ;;  %v488_v58 = vrot.slane %v486_v45, 7  ;;  %v607_v34 = vsel %vm2945_vm7, %v475_v5, %v606_v47  ;;  %v610_v59 = vsel %vm2817_vm5, %v476_v6, %v609_v55  ;;  %605 = vst [vmem:[#allocation3 + $0x7c] sm:$0x1] %v604_v28  ;;  %v3121_v40 = vcombine.low %v3043_v15, %v641_v42  ;;  %v643_v47 = vld [vmem:[#allocation3 + $0x44] sm:$0x1] }
  0xb8   :  { %608 = vst [vmem:[#allocation3 + $0x80] sm:$0xf] %v607_v34  ;;  %611 = vst [vmem:[#allocation3 + $0x84] sm:$0x1] %v610_v59  ;;  %v894_v18 = vrot.slane %v3098_v29, 1  ;;  %v895_v63 = vrot.slane %v3110_v38, 1  ;;  %v3128_v19 = vcombine.low %v3029_v62, %v643_v47 }
  0xb9   :  { %v491_v26 = vor.u32 %v489_v48, %v488_v58  ;;  %v492_v27 = vrot.slane %v488_v58, 4  ;;  %v897_v45 = vrot.slane %v3121_v40, 1  ;;  %v756_v13 = vshll.u32 %v3032_v0, 16  ;;  %v2660_v5 = vld [vmem:[%s4582_s1] sm:$0xff]  }
  0xba   :  { %1092 = vrot.lane.b32.xlu1 %v2382_v32, %s2700_s10  ;;  %v612_v32 = vld [vmem:[#allocation3 + $0x88] sm:$0xf]  ;;  %v1042_v48 = vrot.slane %v3128_v19, 1  ;;  %v770_v53 = vshll.u32 %v3066_v61, 16  ;;  %v754_v62 = vshrl.u32 %v3032_v0, 16  ;;  %v768_v3 = vshrl.u32 %v3066_v61, 16  ;;  %2545 = vmatprep.subr.bf16.mxu0 %v2660_v5 }
  0xbb   :  { %1090 = vrot.lane.b32.xlu0 %v2381_v54, %s2700_s10  ;;  %v589_v54 = vsel %vm2945_vm7, %v451_v11, %v588_v57  ;;  %v619_v36 = vsel %vm2945_vm7, %v491_v26, %v618_v20  ;;  %v622_v60 = vsel %vm2817_vm5, %v492_v27, %v621_v21  ;;  %v613_v37 = vsel %vm2945_vm7, %v483_v30, %v612_v32  ;;  %v2664_v0 = vld [vmem:[%s4582_s1 + $0x8] sm:$0xff]   ;;  %v3172_v30 = vpop.permute.xlu1 %1096 }
  0xbc   :  { %590 = vst [vmem:[#allocation3 + $0x68] sm:$0xf] %v589_v54  ;;  %620 = vst [vmem:[#allocation3 + $0x90] sm:$0xf] %v619_v36  ;;  %v616_v57 = vsel %vm2817_vm5, %v484_v39, %v615_v25  ;;  %v758_v50 = vrot.slane %v756_v13, 1  ;;  %v763_v11 = vshll.u32 %v3060_v33, 16  ;;  %2567 = vmatprep.subr.bf16.mxu1 %v2660_v5  ;;  %2546 = vmatpush3.bf16.msra.mxu0 %v2660_v5  ;;  %v3176_v36 = vpop.permute.xlu0 %906 }
  0xbd   :  { %623 = vst [vmem:[#allocation3 + $0x94] sm:$0x1] %v622_v60  ;;  %614 = vst [vmem:[#allocation3 + $0x88] sm:$0xf] %v613_v37  ;;  %v772_v58 = vrot.slane %v770_v53, 1  ;;  %v777_v54 = vshll.u32 %v3098_v29, 16  ;;  %2570 = vmatpush3.bf16.msra.mxu1 %v2660_v5  ;;  %2547 = vmatprep.subr.bf16.mxu0 %v2664_v0 }
  0xbe   :  { %908 = vrot.lane.b32.xlu1 %v891_v24, %s2699_s9  ;;  %617 = vst [vmem:[#allocation3 + $0x8c] sm:$0x1] %v616_v57  ;;  %v759_v55 = vor.u32 %v758_v50, %v754_v62  ;;  %v765_v56 = vrot.slane %v763_v11, 1  ;;  %2568 = vmatprep.subr.bf16.mxu1 %v2664_v0  ;;  %v775_v61 = vshrl.u32 %v3098_v29, 16  ;;  %v784_v16 = vshll.u32 %v3110_v38, 16 }
  0xbf   :  { %1094 = vrot.lane.b32.xlu0 %v3041_v9, %s2700_s10  ;;  %v601_v9 = vsel %vm2945_vm7, %v467_v14, %v600_v2  ;;  %v761_v2 = vshrl.u32 %v3060_v33, 16  ;;  %v773_v10 = vor.u32 %v772_v58, %v768_v3  ;;  %v779_v33 = vrot.slane %v777_v54, 1  ;;  %v3183_v29 = vld [vmem:[#allocation3 + $0x58] sm:$0xf]  ;;  %v3187_v1 = vpop.permute.xlu1 %1182  ;;  %vm4248_vm7 = vmand %vm1882_vm2, %vm239_vm4 }
  0xc0   :  { %602 = vst [vmem:[#allocation3 + $0x78] sm:$0xf] %v601_v9  ;;  %2548 = vmatpush3.bf16.msra.mxu0 %v2664_v0  ;;  %v1567_v20 = vsel %vm1565_vm8, %v2665_v12, 0  ;;  %v782_v21 = vshrl.u32 %v3110_v38, 16  ;;  %v786_v34 = vrot.slane %v784_v16, 1  ;;  %v798_v25 = vshll.u32 %v3121_v40, 16 }
  0xc1   :  { %v766_v6 = vor.u32 %v765_v56, %v761_v2  ;;  %2571 = vmatpush3.bf16.msra.mxu1 %v2664_v0  ;;  %v780_v14 = vor.u32 %v779_v33, %v775_v61  ;;  %2573 = vmatprep.subr.msk.bf16.mxu0 %vm1565_vm8, %v2665_v12  ;;  %v796_v9 = vshrl.u32 %v3121_v40, 16  ;;  %v999_v4 = vshll.u32 %v3128_v19, 16  ;;  %4599 = vst [vmem:[#allocation12_spill] sm:$0xff] %v3183_v29  ;;  %v3197_v40 = vpop.permute.xlu0 %858 }
  0xc2   :  { %912 = vrot.lane.b32.xlu1 %v893_v35, %s2699_s9  ;;  %2574 = vmatprep.subr.msk.bf16.mxu1 %vm1565_vm8, %v2665_v12  ;;  %v787_v32 = vor.u32 %v786_v34, %v782_v21  ;;  %v800_v28 = vrot.slane %v798_v25, 1  ;;  %4600 = vst [vmem:[#allocation13_spill] sm:$0xff] %v3187_v1  ;;  %v997_v38 = vshrl.u32 %v3128_v19, 16  ;;  %v898_v61 = vrot.slane %v2896_v17, 1  ;;  %v655_v17 = vld [vmem:[#allocation3 + $0x74] sm:$0x1] }
  0xc3   :  { %910 = vrot.lane.b32.xlu0 %v892_v31, %s2699_s9  ;;  %v3195_v42 = vld [vmem:[#allocation3 + $0x68] sm:$0xf] }
  0xc4   :  { %2550 = vmatpush3.bf16.msra.mxu0 %v1567_v20  ;;  %v801_v60 = vor.u32 %v800_v28, %v796_v9  ;;  %4602 = vst [vmem:[#allocation15_spill] sm:$0xff] %v3195_v42 }
  0xc5   :  { %2572 = vmatpush3.bf16.msra.mxu1 %v1567_v20  ;;  %v3208_v13 = vpop.permute.xlu0 %874 }
  0xc6   :  { %1046 = vrot.lane.b32.xlu1 %v892_v31, %s2705_s15  ;;  %4604 = vst [vmem:[#allocation17_spill] sm:$0xff] %v3208_v13 }
  0xc7   :  { %1044 = vrot.lane.b32.xlu0 %v891_v24, %s2705_s15  ;;  %v639_v24 = vld [vmem:[#allocation3 + $0x34] sm:$0x1] }
  0xc8   :  { %v3118_v43 = vcombine.low %v3019_v49, %v639_v24  ;;  %v3193_v24 = vld [vmem:[#allocation3 + $0x60] sm:$0xf] }
  0xc9   :  { %4601 = vst [vmem:[#allocation14_spill] sm:$0xff] %v3193_v24  ;;  %v2370_v47 = vcombine.low %v3193_v24, %v651_v46  ;;  %v2385_v9 = vcombine.low %v3193_v24, %v3193_v24 }
  0xca   :  { %1050 = vrot.lane.b32.xlu1 %v894_v18, %s2705_s15  ;;  %v896_v44 = vrot.slane %v3118_v43, 1  ;;  %v791_v59 = vshll.u32 %v3118_v43, 16  ;;  %v789_v26 = vshrl.u32 %v3118_v43, 16  ;;  %v653_v43 = vld [vmem:[#allocation3 + $0x6c] sm:$0x1] }
  0xcb   :  { %1048 = vrot.lane.b32.xlu0 %v893_v35, %s2705_s15  ;;  %v2371_v19 = vcombine.low %v3195_v42, %v653_v43  ;;  %v819_v53 = vshll.u32 %v2370_v47, 16  ;;  %v817_v56 = vshrl.u32 %v2370_v47, 16  ;;  %v3243_v34 = vrot.slane %v2370_v47, 1 }
  0xcc   :  { %v793_v27 = vrot.slane %v791_v59, 1 }
  0xcd   :  { %v826_v62 = vshll.u32 %v2371_v19, 16  ;;  %v821_v3 = vrot.slane %v819_v53, 1  ;;  %v824_v5 = vshrl.u32 %v2371_v19, 16  ;;  %v3245_v59 = vrot.slane %v2371_v19, 1 }
  0xce   :  { %1170 = vrot.lane.b32.xlu1 %v893_v35, %s2702_s12  ;;  %v794_v39 = vor.u32 %v793_v27, %v789_v26  ;;  %v298_v35 = vld [vmem:[#allocation3 + $0x9c] sm:$0x1]  ;;  %v2384_v27 = vcombine.low %v3183_v29, %v3183_v29 }
  0xcf   :  { %1168 = vrot.lane.b32.xlu0 %v892_v31, %s2702_s12  ;;  %v236_v31 = vld [vmem:[#allocation3 + $0x98] sm:$0x1]  ;;  %v299_v57 = vsel %vm2827_vm6, 0, %v298_v35  ;;  %v3223_v0 = vor.u32 %v821_v3, %v817_v56  ;;  %v2386_v35 = vcombine.low %v3195_v42, %v3195_v42 }
  0xd0   :  { %v237_v37 = vsel %vm2817_vm5, 0, %v236_v31  ;;  %300 = vst [vmem:[#allocation3 + $0x9c] sm:$0x1] %v299_v57  ;;  %vm624_vm5 = vcmask 57344  }
  0xd1   :  { %238 = vst [vmem:[#allocation3 + $0x98] sm:$0x1] %v237_v37  ;;  %vm3714_vm6 = vmand %vm624_vm5, %vm177_vm3 }
  0xd2   :  { %1174 = vrot.lane.b32.xlu1 %v895_v63, %s2702_s12  ;;  %vm3857_vm3 = vmand %vm624_vm5, %vm239_vm4 }
  0xd3   :  { %1172 = vrot.lane.b32.xlu0 %v894_v18, %s2702_s12 }
  0xd6   :  { %916 = vrot.lane.b32.xlu1 %v895_v63, %s2699_s9 }
  0xd7   :  { %914 = vrot.lane.b32.xlu0 %v894_v18, %s2699_s9  ;;  %v649_v18 = vld [vmem:[#allocation3 + $0x5c] sm:$0x1] }
  0xd8   :  { %v3191_v41 = vcombine.low %v3183_v29, %v649_v18 }
  0xda   :  { %920 = vrot.lane.b32.xlu1 %v897_v45, %s2699_s9  ;;  %v810_v50 = vshrl.u32 %v3191_v41, 16  ;;  %v899_v16 = vrot.slane %v3191_v41, 1 }
  0xdb   :  { %918 = vrot.lane.b32.xlu0 %v896_v44, %s2699_s9 }
  0xde   :  { %1054 = vrot.lane.b32.xlu1 %v896_v44, %s2705_s15 }
  0xdf   :  { %1052 = vrot.lane.b32.xlu0 %v895_v63, %s2705_s15  ;;  %v1001_v63 = vrot.slane %v999_v4, 1 }
  0xe2   :  { %1058 = vrot.lane.b32.xlu1 %v1042_v48, %s2705_s15 }
  0xe3   :  { %1056 = vrot.lane.b32.xlu0 %v897_v45, %s2705_s15 }
  0xe6   :  { %1178 = vrot.lane.b32.xlu1 %v897_v45, %s2702_s12  ;;  %v812_v45 = vshll.u32 %v3191_v41, 16 }
  0xe7   :  { %1176 = vrot.lane.b32.xlu0 %v896_v44, %s2702_s12  ;;  %v1002_v44 = vor.u32 %v1001_v63, %v997_v38 }
  0xe8   :  { %v814_v11 = vrot.slane %v812_v45, 1 }
  0xea   :  { %860 = vrot.lane.b32.xlu1 %v759_v55, %s2701_s11  ;;  %v815_v2 = vor.u32 %v814_v11, %v810_v50  ;;  %v3299_v50 = vld [vmem:[#allocation3 + $0x78] sm:$0xf]  ;;  %v657_v11 = vld [vmem:[#allocation3 + $0x7c] sm:$0x1] }
  0xeb   :  { %1180 = vrot.lane.b32.xlu0 %v1042_v48, %s2702_s12  ;;  %v3204_v48 = vpop.permute.xlu1 %1148  ;;  %4607 = vst [vmem:[#allocation20_spill] sm:$0xff] %v3299_v50  ;;  %v2373_v56 = vcombine.low %v3299_v50, %v657_v11 }
  0xec   :  { %4603 = vst [vmem:[#allocation16_spill] sm:$0xff] %v3204_v48  ;;  %v662_v48 = vld [vmem:[#allocation3 + $0x90] sm:$0xf] }
  0xee   :  { %864 = vrot.lane.b32.xlu1 %v773_v10, %s2701_s11 }
  0xef   :  { %862 = vrot.lane.b32.xlu0 %v766_v6, %s2701_s11 }
  0xf2   :  { %1012 = vrot.lane.b32.xlu1 %v766_v6, %s2706_s20 }
  0xf3   :  { %1010 = vrot.lane.b32.xlu0 %v759_v55, %s2706_s20 }
  0xf6   :  { %1016 = vrot.lane.b32.xlu1 %v780_v14, %s2706_s20 }
  0xf7   :  { %1014 = vrot.lane.b32.xlu0 %v773_v10, %s2706_s20 }
  0xfa   :  { %1136 = vrot.lane.b32.xlu1 %v773_v10, %s2703_s13 }
  0xfb   :  { %1134 = vrot.lane.b32.xlu0 %v766_v6, %s2703_s13  ;;  %v828_v6 = vrot.slane %v826_v62, 1 }
  0xfd   :  { %v3225_v33 = vor.u32 %v828_v6, %v824_v5  ;;  %v3317_v5 = vcombine.low %v3299_v50, %v3299_v50  ;;  %v840_v6 = vshll.u32 %v2373_v56, 16 }
  0xfe   :  { %1140 = vrot.lane.b32.xlu1 %v787_v32, %s2703_s13 }
  0xff   :  { %1138 = vrot.lane.b32.xlu0 %v780_v14, %s2703_s13 }
 0x102   :  { %868 = vrot.lane.b32.xlu1 %v787_v32, %s2701_s11 }
 0x103   :  { %866 = vrot.lane.b32.xlu0 %v780_v14, %s2701_s11 }
 0x106   :  { %872 = vrot.lane.b32.xlu1 %v801_v60, %s2701_s11 }
 0x107   :  { %870 = vrot.lane.b32.xlu0 %v794_v39, %s2701_s11 }
 0x10a   :  { %1020 = vrot.lane.b32.xlu1 %v794_v39, %s2706_s20 }
 0x10b   :  { %1018 = vrot.lane.b32.xlu0 %v787_v32, %s2706_s20  ;;  %v3247_v32 = vld [vmem:[#allocation3 + $0x70] sm:$0xf] }
 0x10c   :  { %4605 = vst [vmem:[#allocation18_spill] sm:$0xff] %v3247_v32  ;;  %v2372_v28 = vcombine.low %v3247_v32, %v655_v17  ;;  %v838_v17 = vshrl.u32 %v2373_v56, 16 }
 0x10e   :  { %1024 = vrot.lane.b32.xlu1 %v1002_v44, %s2706_s20  ;;  %v833_v4 = vshll.u32 %v2372_v28, 16  ;;  %v831_v18 = vshrl.u32 %v2372_v28, 16  ;;  %v902_v19 = vrot.slane %v2372_v28, 1 }
 0x10f   :  { %1022 = vrot.lane.b32.xlu0 %v801_v60, %s2706_s20 }
 0x110   :  { %v835_v38 = vrot.slane %v833_v4, 1  ;;  %v659_v4 = vld [vmem:[#allocation3 + $0x84] sm:$0x1] }
 0x112   :  { %1144 = vrot.lane.b32.xlu1 %v801_v60, %s2703_s13  ;;  %v2387_v60 = vcombine.low %v3247_v32, %v3247_v32  ;;  %v836_v46 = vor.u32 %v835_v38, %v831_v18  ;;  %v3338_v18 = vld [vmem:[#allocation3 + $0x88] sm:$0xf]  ;;  %v661_v38 = vld [vmem:[#allocation3 + $0x8c] sm:$0x1] }
 0x113   :  { %1142 = vrot.lane.b32.xlu0 %v794_v39, %s2703_s13  ;;  %v3213_v55 = vpop.permute.xlu1 %960 }
 0x114   :  { %v3215_v58 = vpop.permute.xlu0 %958 }
 0x116   :  { %876 = vrot.lane.b32.xlu1 %v815_v2, %s2701_s11 }
 0x117   :  { %1146 = vrot.lane.b32.xlu0 %v1002_v44, %s2703_s13 }
 0x118   :  { %v3219_v10 = vpop.permute.xlu1 %964 }
 0x119   :  { %v3221_v54 = vpop.permute.xlu0 %962 }
 0x11a   :  { %880 = vrot.lane.b32.xlu1 %v3225_v33, %s2701_s11 }
 0x11b   :  { %878 = vrot.lane.b32.xlu0 %v3223_v0, %s2701_s11 }
 0x11c   :  { %v3232_v12 = vpop.permute.xlu1 %1084 }
 0x11d   :  { %v3234_v14 = vpop.permute.xlu0 %1082 }
 0x11e   :  { %924 = vrot.lane.b32.xlu1 %v899_v16, %s2699_s9 }
 0x11f   :  { %922 = vrot.lane.b32.xlu0 %v898_v61, %s2699_s9 }
 0x120   :  { %v3239_v20 = vpop.permute.xlu1 %1088 }
 0x121   :  { %v3241_v21 = vpop.permute.xlu0 %1086 }
 0x122   :  { %928 = vrot.lane.b32.xlu1 %v3245_v59, %s2699_s9 }
 0x123   :  { %926 = vrot.lane.b32.xlu0 %v3243_v34, %s2699_s9 }
 0x124   :  { %v3253_v25 = vpop.permute.xlu1 %968 }
 0x125   :  { %v3255_v26 = vpop.permute.xlu0 %966 }
 0x126   :  { %976 = vrot.lane.b32.xlu1 %v2385_v9, %s2704_s14 }
 0x127   :  { %974 = vrot.lane.b32.xlu0 %v2384_v27, %s2704_s14  ;;  %v842_v27 = vrot.slane %v840_v6, 1  ;;  %v2375_v6 = vcombine.low %v3338_v18, %v661_v38 }
 0x128   :  { %v3264_v39 = vpop.permute.xlu1 %972 }
 0x129   :  { %v3266_v31 = vpop.permute.xlu0 %970  ;;  %v854_v50 = vshll.u32 %v2375_v6, 16  ;;  %v3390_v1 = vrot.slane %v2375_v6, 1 }
 0x12a   :  { %980 = vrot.lane.b32.xlu1 %v2387_v60, %s2704_s14 }
 0x12b   :  { %978 = vrot.lane.b32.xlu0 %v2386_v35, %s2704_s14  ;;  %v856_v24 = vrot.slane %v854_v50, 1 }
 0x12c   :  { %v3274_v37 = vpop.permute.xlu1 %1092 }
 0x12d   :  { %v3276_v57 = vpop.permute.xlu0 %1090 }
 0x12e   :  { %1028 = vrot.lane.b32.xlu1 %v3223_v0, %s2706_s20 }
 0x12f   :  { %1026 = vrot.lane.b32.xlu0 %v815_v2, %s2706_s20 }
 0x130   :  { %v3283_v41 = vpop.permute.xlu1 %908 }
 0x131   :  { %v3281_v63 = vpop.permute.xlu0 %1094 }
 0x132   :  { %4606 = vst [vmem:[#allocation19_spill] sm:$0xff] %v3281_v63  ;;  %1032 = vrot.lane.b32.xlu1 %v836_v46, %s2706_s20  ;;  %v2670_v63 = vld [vmem:[#allocation3] sm:$0xf] }
 0x133   :  { %1030 = vrot.lane.b32.xlu0 %v3225_v33, %s2706_s20 }
 0x134   :  { %v3290_v44 = vpop.permute.xlu1 %912 }
 0x135   :  { %v3288_v43 = vpop.permute.xlu0 %910 }
 0x136   :  { %1062 = vrot.lane.b32.xlu1 %v3243_v34, %s2705_s15 }
 0x137   :  { %1060 = vrot.lane.b32.xlu0 %v899_v16, %s2705_s15 }
 0x138   :  { %v3297_v47 = vpop.permute.xlu1 %1046 }
 0x139   :  { %v3295_v45 = vpop.permute.xlu0 %1044 }
 0x13a   :  { %1066 = vrot.lane.b32.xlu1 %v902_v19, %s2705_s15 }
 0x13b   :  { %1064 = vrot.lane.b32.xlu0 %v3245_v59, %s2705_s15 }
 0x13c   :  { %v3306_v62 = vpop.permute.xlu1 %1050 }
 0x13d   :  { %v3304_v53 = vpop.permute.xlu0 %1048 }
 0x13e   :  { %1100 = vrot.lane.b32.xlu1 %v2386_v35, %s2700_s10  ;;  %v3334_v35 = vor.u32 %v842_v27, %v838_v17 }
 0x13f   :  { %1098 = vrot.lane.b32.xlu0 %v2385_v9, %s2700_s10 }
 0x140   :  { %v3313_v3 = vpop.permute.xlu1 %1170 }
 0x141   :  { %v3311_v2 = vpop.permute.xlu0 %1168 }
 0x142   :  { %1104 = vrot.lane.b32.xlu1 %v3317_v5, %s2700_s10 }
 0x143   :  { %1102 = vrot.lane.b32.xlu0 %v2387_v60, %s2700_s10  ;;  %v3336_v60 = vld [vmem:[#allocation3 + $0x80] sm:$0xf] }
 0x144   :  { %v3324_v16 = vpop.permute.xlu1 %1174  ;;  %v2374_v11 = vcombine.low %v3336_v60, %v659_v4  ;;  %v3360_v4 = vrot.slane %v2373_v56, 1 }
 0x145   :  { %v3322_v61 = vpop.permute.xlu0 %1172 }
 0x146   :  { %1152 = vrot.lane.b32.xlu1 %v3225_v33, %s2703_s13  ;;  %v847_v7 = vshll.u32 %v2374_v11, 16 }
 0x147   :  { %1150 = vrot.lane.b32.xlu0 %v3223_v0, %s2703_s13 }
 0x148   :  { %v3332_v28 = vpop.permute.xlu1 %916  ;;  %v849_v42 = vrot.slane %v847_v7, 1 }
 0x149   :  { %v3330_v9 = vpop.permute.xlu0 %914 }
 0x14a   :  { %1156 = vrot.lane.b32.xlu1 %v3334_v35, %s2703_s13 }
 0x14b   :  { %1154 = vrot.lane.b32.xlu0 %v836_v46, %s2703_s13 }
 0x14c   :  { %v3345_v33 = vpop.permute.xlu1 %920 }
 0x14d   :  { %v3343_v0 = vpop.permute.xlu0 %918 }
 0x14e   :  { %1186 = vrot.lane.b32.xlu1 %v3245_v59, %s2702_s12  ;;  %v852_v59 = vshrl.u32 %v2375_v6, 16 }
 0x14f   :  { %1184 = vrot.lane.b32.xlu0 %v3243_v34, %s2702_s12  ;;  %v845_v34 = vshrl.u32 %v2374_v11, 16 }
 0x150   :  { %v3355_v27 = vpop.permute.xlu1 %1054  ;;  %v3375_v56 = vor.u32 %v856_v24, %v852_v59  ;;  %v3388_v59 = vrot.slane %v2374_v11, 1 }
 0x151   :  { %v3353_v17 = vpop.permute.xlu0 %1052  ;;  %v3373_v13 = vor.u32 %v849_v42, %v845_v34 }
 0x152   :  { %884 = vrot.lane.b32.xlu1 %v3334_v35, %s2701_s11 }
 0x153   :  { %882 = vrot.lane.b32.xlu0 %v836_v46, %s2701_s11 }
 0x154   :  { %v3364_v32 = vpop.permute.xlu1 %1058 }
 0x155   :  { %v3362_v38 = vpop.permute.xlu0 %1056 }
 0x156   :  { %1190 = vrot.lane.b32.xlu1 %v3360_v4, %s2702_s12 }
 0x157   :  { %1188 = vrot.lane.b32.xlu0 %v902_v19, %s2702_s12 }
 0x158   :  { %v3371_v46 = vpop.permute.xlu1 %1178 }
 0x159   :  { %v3369_v29 = vpop.permute.xlu0 %1176  ;;  %4608 = vst [vmem:[#allocation21_spill] sm:$0xff] %v3371_v46  ;;  %v663_v46 = vld [vmem:[#allocation3 + $0x94] sm:$0x1] }
 0x15a   :  { %888 = vrot.lane.b32.xlu1 %v3375_v56, %s2701_s11 }
 0x15b   :  { %886 = vrot.lane.b32.xlu0 %v3373_v13, %s2701_s11 }
 0x15c   :  { %v861_v50 = vpop.permute.xlu1 %860 }
 0x15d   :  { %v3381_v7 = vpop.permute.xlu0 %1180  ;;  %v1206_v42 = vsel %vm1200_vm9, %v2979_v52, %v861_v50 }
 0x15e   :  { %4609 = vst [vmem:[#allocation22_spill] sm:$0xff] %v3381_v7  ;;  %932 = vrot.lane.b32.xlu1 %v3360_v4, %s2699_s9  ;;  %v1203_v7 = vsel %vm1200_vm9, %v2670_v63, %v3197_v40 }
 0x15f   :  { %930 = vrot.lane.b32.xlu0 %v902_v19, %s2699_s9  ;;  %v1253_v19 = vsel %vm1249_vm10, %v1206_v42, %v3283_v41  ;;  %v1251_v40 = vsel %vm1249_vm10, %v1203_v7, %v3176_v36  ;;  %v3408_v41 = vcombine.low %v3336_v60, %v3336_v60 }
 0x160   :  { %v865_v34 = vpop.permute.xlu1 %864  ;;  %v1284_v50 = vsel %vm1282_vm11, %v1251_v40, %v3215_v58 }
 0x161   :  { %v863_v24 = vpop.permute.xlu0 %862  ;;  %v1212_v11 = vsel %vm1200_vm9, %v2998_v23, %v865_v34  ;;  %v1286_v23 = vsel %vm1282_vm11, %v1253_v19, %v3213_v55  ;;  %v3430_v55 = vcombine.low %v662_v48, %v662_v48 }
 0x162   :  { %v1209_v52 = vsel %vm1200_vm9, %v2977_v51, %v863_v24  ;;  %936 = vrot.lane.b32.xlu1 %v3390_v1, %s2699_s9  ;;  %v3410_v51 = vcombine.low %v662_v48, %v663_v46  ;;  %v1257_v36 = vsel %vm1249_vm10, %v1212_v11, %v3290_v44 }
 0x163   :  { %934 = vrot.lane.b32.xlu0 %v3388_v59, %s2699_s9  ;;  %v1255_v42 = vsel %vm1249_vm10, %v1209_v52, %v3288_v43  ;;  %v3428_v43 = vcombine.low %v3338_v18, %v3338_v18  ;;  %v1290_v52 = vsel %vm1282_vm11, %v1257_v36, %v3219_v10 }
 0x164   :  { %v1013_v6 = vpop.permute.xlu1 %1012  ;;  %v1006_v44 = vshll.u32 %v3410_v51, 16  ;;  %v1288_v19 = vsel %vm1282_vm11, %v1255_v42, %v3221_v54  ;;  %v1004_v40 = vshrl.u32 %v3410_v51, 16 }
 0x165   :  { %v1011_v63 = vpop.permute.xlu0 %1010  ;;  %v1319_v24 = vsel %vm1315_vm12, %v1286_v23, %v1013_v6 }
 0x166   :  { %v1317_v7 = vsel %vm1315_vm12, %v1284_v50, %v1011_v63  ;;  %984 = vrot.lane.b32.xlu1 %v3408_v41, %s2704_s14  ;;  %v1008_v63 = vrot.slane %v1006_v44, 1 }
 0x167   :  { %982 = vrot.lane.b32.xlu0 %v3317_v5, %s2704_s14  ;;  %v1350_v34 = vsel %vm1348_vm13, %v1317_v7, %v3295_v45  ;;  %v1352_v5 = vsel %vm1348_vm13, %v1319_v24, %v3297_v47 }
 0x168   :  { %v1017_v46 = vpop.permute.xlu1 %1016  ;;  %v1383_v45 = vsel %vm1381_vm14, %v1350_v34, %v3234_v14  ;;  %v1385_v54 = vsel %vm1381_vm14, %v1352_v5, %v3232_v12 }
 0x169   :  { %v1015_v58 = vpop.permute.xlu0 %1014  ;;  %v1323_v48 = vsel %vm1315_vm12, %v1290_v52, %v1017_v46  ;;  %v1043_v52 = vrot.slane %v3410_v51, 1 }
 0x16a   :  { %v1321_v11 = vsel %vm1315_vm12, %v1288_v19, %v1015_v58  ;;  %988 = vrot.lane.b32.xlu1 %v3430_v55, %s2704_s14  ;;  %v1356_v50 = vsel %vm1348_vm13, %v1323_v48, %v3306_v62 }
 0x16b   :  { %986 = vrot.lane.b32.xlu0 %v3428_v43, %s2704_s14  ;;  %v1354_v6 = vsel %vm1348_vm13, %v1321_v11, %v3304_v53  ;;  %v1389_v7 = vsel %vm1381_vm14, %v1356_v50, %v3239_v20  ;;  %v664_v11 = vld [vmem:[#allocation3 + $0x98] sm:$0xf] }
 0x16c   :  { %v1137_v10 = vpop.permute.xlu1 %1136  ;;  %v1387_v62 = vsel %vm1381_vm14, %v1354_v6, %v3241_v21 }
 0x16d   :  { %v1135_v47 = vpop.permute.xlu0 %1134  ;;  %v1418_v23 = vsel %vm1414_vm15, %v1385_v54, %v1137_v10  ;;  %v2395_v10 = vcombine.low %v664_v11, %v664_v11 }
 0x16e   :  { %v1416_v42 = vsel %vm1414_vm15, %v1383_v45, %v1135_v47  ;;  %1036 = vrot.lane.b32.xlu1 %v3373_v13, %s2706_s20  ;;  %v1451_v14 = vsel %vm1447_vm0, %v1418_v23, %v3313_v3 }
 0x16f   :  { %1034 = vrot.lane.b32.xlu0 %v3334_v35, %s2706_s20  ;;  %v1449_v12 = vsel %vm1447_vm0, %v1416_v42, %v3311_v2  ;;  %v3470_v35 = vor.u32 %v1008_v63, %v1004_v40 }
 0x170   :  { %v2398_v53 = vcombine.low %v1449_v12, %v1451_v14  ;;  %v1141_v24 = vpop.permute.xlu1 %1140 }
 0x171   :  { %v1139_v36 = vpop.permute.xlu0 %1138  ;;  %v1422_v46 = vsel %vm1414_vm15, %v1389_v7, %v1141_v24  ;;  %v4610_v7 = vld [vmem:[#allocation21_spill] sm:$0xff]  ;;  %v4611_v24 = vld [vmem:[#allocation16_spill] sm:$0xff] }
 0x172   :  { %v1420_v58 = vsel %vm1414_vm15, %v1387_v62, %v1139_v36  ;;  %2551 = vmatprep.mubr.msk.bf16.mxu0 %vm1540_vm1, %v2398_v53  ;;  %v1455_v3 = vsel %vm1447_vm0, %v1422_v46, %v3324_v16  ;;  %1040 = vrot.lane.b32.xlu1 %v3470_v35, %s2706_s20 }
 0x173   :  { %v1453_v2 = vsel %vm1447_vm0, %v1420_v58, %v3322_v61  ;;  %1038 = vrot.lane.b32.xlu0 %v3375_v56, %s2706_s20  ;;  %v665_v61 = vld [vmem:[#allocation3 + $0x9c] sm:$0x1] }
 0x174   :  { %v2399_v20 = vcombine.low %v1453_v2, %v1455_v3  ;;  %v869_v44 = vpop.permute.xlu1 %868  ;;  %v3493_v48 = vcombine.low %v664_v11, %v665_v61  ;;  %v4612_v58 = vld [vmem:[#allocation19_spill] sm:$0xff] }
 0x175   :  { %v867_v21 = vpop.permute.xlu0 %866  ;;  %v1218_v34 = vsel %vm1200_vm9, %v3013_v8, %v869_v44 }
 0x176   :  { %2552 = vmatmul.mubr.msk.bf16.vlgmr.msra.gmra.mrb[0].mxu0 %vm1540_vm1, %v2399_v20  ;;  %1070 = vrot.lane.b32.xlu1 %v3388_v59, %s2705_s15  ;;  %v1215_v16 = vsel %vm1200_vm9, %v2996_v22, %v867_v21  ;;  %v1261_v45 = vsel %vm1249_vm10, %v1218_v34, %v3332_v28  ;;  %v4613_v20 = vld [vmem:[#allocation22_spill] sm:$0xff]  ;;  %v4614_v21 = vld [vmem:[#allocation13_spill] sm:$0xff]  ;;  %v1167_v34 = vrot.slane %v3493_v48, 1 }
 0x177   :  { %1068 = vrot.lane.b32.xlu0 %v3360_v4, %s2705_s15  ;;  %v1259_v4 = vsel %vm1249_vm10, %v1215_v16, %v3330_v9 }
 0x178   :  { %v873_v19 = vpop.permute.xlu1 %872  ;;  %v1292_v28 = vsel %vm1282_vm11, %v1259_v4, %v3255_v26 }
 0x179   :  { %v871_v5 = vpop.permute.xlu0 %870  ;;  %v1224_v47 = vsel %vm1200_vm9, %v3043_v15, %v873_v19  ;;  %v1294_v15 = vsel %vm1282_vm11, %v1261_v45, %v3253_v25 }
 0x17a   :  { %1074 = vrot.lane.b32.xlu1 %v1043_v52, %s2705_s15  ;;  %v1221_v22 = vsel %vm1200_vm9, %v3019_v49, %v871_v5  ;;  %v1265_v9 = vsel %vm1249_vm10, %v1224_v47, %v3345_v33  ;;  %v1130_v49 = vshll.u32 %v3493_v48, 16 }
 0x17b   :  { %1072 = vrot.lane.b32.xlu0 %v3390_v1, %s2705_s15  ;;  %v1263_v40 = vsel %vm1249_vm10, %v1221_v22, %v3343_v0  ;;  %v1298_v25 = vsel %vm1282_vm11, %v1265_v9, %v3264_v39  ;;  %v1128_v39 = vshrl.u32 %v3493_v48, 16 }
 0x17c   :  { %v1021_v54 = vpop.permute.xlu1 %1020  ;;  %v1296_v42 = vsel %vm1282_vm11, %v1263_v40, %v3266_v31 }
 0x17d   :  { %v1019_v8 = vpop.permute.xlu0 %1018  ;;  %v1327_v6 = vsel %vm1315_vm12, %v1294_v15, %v1021_v54 }
 0x17e   :  { %v1325_v63 = vsel %vm1315_vm12, %v1292_v28, %v1019_v8  ;;  %1108 = vrot.lane.b32.xlu1 %v3428_v43, %s2700_s10  ;;  %v1360_v50 = vsel %vm1348_vm13, %v1327_v6, %v3355_v27 }
 0x17f   :  { %1106 = vrot.lane.b32.xlu0 %v3408_v41, %s2700_s10  ;;  %v1358_v0 = vsel %vm1348_vm13, %v1325_v63, %v3353_v17  ;;  %v1132_v17 = vrot.slane %v1130_v49, 1  ;;  %v1393_v14 = vsel %vm1381_vm14, %v1360_v50, %v3274_v37  ;;  %v2671_v49 = vld [vmem:[#allocation3 + $0x50] sm:$0xf] }
 0x180   :  { %v1025_v33 = vpop.permute.xlu1 %1024  ;;  %v1391_v31 = vsel %vm1381_vm14, %v1358_v0, %v3276_v57 }
 0x181   :  { %v1023_v26 = vpop.permute.xlu0 %1022  ;;  %v1331_v41 = vsel %vm1315_vm12, %v1298_v25, %v1025_v33  ;;  %v1133_v37 = vor.u32 %v1132_v17, %v1128_v39  ;;  %v4616_v33 = vld [vmem:[#allocation12_spill] sm:$0xff] }
 0x182   :  { %v1329_v43 = vsel %vm1315_vm12, %v1296_v42, %v1023_v26  ;;  %v1364_v23 = vsel %vm1348_vm13, %v1331_v41, %v3364_v32  ;;  %1112 = vrot.lane.b32.xlu1 %v2395_v10, %s2700_s10  ;;  %v4615_v26 = vld [vmem:[#allocation17_spill] sm:$0xff] }
 0x183   :  { %1110 = vrot.lane.b32.xlu0 %v3430_v55, %s2700_s10  ;;  %v1397_v27 = vsel %vm1381_vm14, %v1364_v23, %v3172_v30  ;;  %v1362_v32 = vsel %vm1348_vm13, %v1329_v43, %v3362_v38  ;;  %v1227_v25 = vsel %vm1200_vm9, %v2671_v49, %v4615_v26 }
 0x184   :  { %v1145_v53 = vpop.permute.xlu1 %1144  ;;  %v1430_v38 = vsel %vm1414_vm15, %v1397_v27, %v4611_v24  ;;  %v1395_v46 = vsel %vm1381_vm14, %v1362_v32, %v4612_v58  ;;  %v4618_v24 = vld [vmem:[#allocation15_spill] sm:$0xff] }
 0x185   :  { %v1143_v12 = vpop.permute.xlu0 %1142  ;;  %v1426_v62 = vsel %vm1414_vm15, %v1393_v14, %v1145_v53 }
 0x186   :  { %v1424_v55 = vsel %vm1414_vm15, %v1391_v31, %v1143_v12  ;;  %v1459_v30 = vsel %vm1447_vm0, %v1426_v62, %v4610_v7  ;;  %1160 = vrot.lane.b32.xlu1 %v3375_v56, %s2703_s13  ;;  %v1463_v56 = vsel %vm1447_vm0, %v1430_v38, %v4614_v21 }
 0x187   :  { %v1457_v36 = vsel %vm1447_vm0, %v1424_v55, %v3369_v29  ;;  %1158 = vrot.lane.b32.xlu0 %v3373_v13, %s2703_s13 }
 0x188   :  { %v2400_v57 = vcombine.low %v1457_v36, %v1459_v30  ;;  %v877_v3 = vpop.permute.xlu1 %876 }
 0x189   :  { %v1147_v2 = vpop.permute.xlu0 %1146  ;;  %v1230_v0 = vsel %vm1200_vm9, %v4616_v33, %v877_v3 }
 0x18a   :  { %v1428_v29 = vsel %vm1414_vm15, %v1395_v46, %v1147_v2  ;;  %2555 = vmatprep.mubr.msk.bf16.mxu0 %vm1540_vm1, %v2400_v57  ;;  %1164 = vrot.lane.b32.xlu1 %v1133_v37, %s2703_s13  ;;  %v4617_v37 = vld [vmem:[#allocation14_spill] sm:$0xff] }
 0x18b   :  { %v1461_v13 = vsel %vm1447_vm0, %v1428_v29, %v4613_v20  ;;  %1162 = vrot.lane.b32.xlu0 %v3470_v35, %s2703_s13 }
 0x18c   :  { %v2401_v44 = vcombine.low %v1461_v13, %v1463_v56  ;;  %v881_v16 = vpop.permute.xlu1 %880 }
 0x18d   :  { %v879_v61 = vpop.permute.xlu0 %878  ;;  %v1236_v38 = vsel %vm1200_vm9, %v4618_v24, %v881_v16 }
 0x18e   :  { %2556 = vmatmul.mubr.msk.bf16.gmra.mrb[4].mxu0 %vm1540_vm1, %v2401_v44  ;;  %1194 = vrot.lane.b32.xlu1 %v3390_v1, %s2702_s12  ;;  %v1233_v57 = vsel %vm1200_vm9, %v4617_v37, %v879_v61 }
 0x18f   :  { %1192 = vrot.lane.b32.xlu0 %v3388_v59, %s2702_s12 }
 0x190   :  { %v925_v19 = vpop.permute.xlu1 %924 }
 0x191   :  { %v923_v5 = vpop.permute.xlu0 %922  ;;  %v1269_v42 = vsel %vm1249_vm10, %v1230_v0, %v925_v19 }
 0x192   :  { %1198 = vrot.lane.b32.xlu1 %v1167_v34, %s2702_s12  ;;  %v1267_v50 = vsel %vm1249_vm10, %v1227_v25, %v923_v5 }
 0x193   :  { %1196 = vrot.lane.b32.xlu0 %v1043_v52, %s2702_s12 }
 0x194   :  { %v929_v11 = vpop.permute.xlu1 %928 }
 0x195   :  { %v927_v35 = vpop.permute.xlu0 %926  ;;  %v1273_v2 = vsel %vm1249_vm10, %v1236_v38, %v929_v11 }
 0x196   :  { %v1271_v46 = vsel %vm1249_vm10, %v1233_v57, %v927_v35 }
 0x198   :  { %v977_v45 = vpop.permute.xlu1 %976 }
 0x199   :  { %v975_v4 = vpop.permute.xlu0 %974  ;;  %v1302_v43 = vsel %vm1282_vm11, %v1269_v42, %v977_v45 }
 0x19a   :  { %v1300_v41 = vsel %vm1282_vm11, %v1267_v50, %v975_v4 }
 0x19c   :  { %v981_v22 = vpop.permute.xlu1 %980 }
 0x19d   :  { %v979_v47 = vpop.permute.xlu0 %978  ;;  %v1306_v29 = vsel %vm1282_vm11, %v1273_v2, %v981_v22 }
 0x19e   :  { %v1304_v3 = vsel %vm1282_vm11, %v1271_v46, %v979_v47 }
 0x1a0   :  { %v1029_v8 = vpop.permute.xlu1 %1028 }
 0x1a1   :  { %v1027_v59 = vpop.permute.xlu0 %1026  ;;  %v1335_v27 = vsel %vm1315_vm12, %v1302_v43, %v1029_v8 }
 0x1a2   :  { %v1333_v17 = vsel %vm1315_vm12, %v1300_v41, %v1027_v59 }
 0x1a4   :  { %v1033_v1 = vpop.permute.xlu1 %1032 }
 0x1a5   :  { %v1031_v54 = vpop.permute.xlu0 %1030  ;;  %v1339_v56 = vsel %vm1315_vm12, %v1306_v29, %v1033_v1 }
 0x1a6   :  { %v1337_v21 = vsel %vm1315_vm12, %v1304_v3, %v1031_v54 }
 0x1a8   :  { %v1063_v48 = vpop.permute.xlu1 %1062 }
 0x1a9   :  { %v1061_v9 = vpop.permute.xlu0 %1060  ;;  %v1368_v12 = vsel %vm1348_vm13, %v1335_v27, %v1063_v48 }
 0x1aa   :  { %v1366_v31 = vsel %vm1348_vm13, %v1333_v17, %v1061_v9  ;;  %v4620_v17 = vld [vmem:[#allocation20_spill] sm:$0xff] }
 0x1ac   :  { %v1067_v15 = vpop.permute.xlu1 %1066 }
 0x1ad   :  { %v1065_v28 = vpop.permute.xlu0 %1064  ;;  %v1372_v61 = vsel %vm1348_vm13, %v1339_v56, %v1067_v15 }
 0x1ae   :  { %v1370_v44 = vsel %vm1348_vm13, %v1337_v21, %v1065_v28 }
 0x1b0   :  { %v1101_v40 = vpop.permute.xlu1 %1100 }
 0x1b1   :  { %v1099_v10 = vpop.permute.xlu0 %1098  ;;  %v1401_v53 = vsel %vm1381_vm14, %v1368_v12, %v1101_v40 }
 0x1b2   :  { %v1399_v14 = vsel %vm1381_vm14, %v1366_v31, %v1099_v10 }
 0x1b4   :  { %v1105_v52 = vpop.permute.xlu1 %1104 }
 0x1b5   :  { %v1103_v51 = vpop.permute.xlu0 %1102  ;;  %v1405_v34 = vsel %vm1381_vm14, %v1372_v61, %v1105_v52 }
 0x1b6   :  { %v1403_v16 = vsel %vm1381_vm14, %v1370_v44, %v1103_v51 }
 0x1b8   :  { %v1153_v6 = vpop.permute.xlu1 %1152 }
 0x1b9   :  { %v1151_v63 = vpop.permute.xlu0 %1150  ;;  %v1434_v55 = vsel %vm1414_vm15, %v1401_v53, %v1153_v6 }
 0x1ba   :  { %v1432_v32 = vsel %vm1414_vm15, %v1399_v14, %v1151_v63 }
 0x1bc   :  { %v1157_v39 = vpop.permute.xlu1 %1156 }
 0x1bd   :  { %v1155_v23 = vpop.permute.xlu0 %1154  ;;  %v1438_v19 = vsel %vm1414_vm15, %v1405_v34, %v1157_v39 }
 0x1be   :  { %v1436_v5 = vsel %vm1414_vm15, %v1403_v16, %v1155_v23  ;;  %v4619_v23 = vld [vmem:[#allocation18_spill] sm:$0xff] }
 0x1c0   :  { %v1187_v36 = vpop.permute.xlu1 %1186 }
 0x1c1   :  { %v1185_v62 = vpop.permute.xlu0 %1184  ;;  %v1467_v30 = vsel %vm1447_vm0, %v1434_v55, %v1187_v36 }
 0x1c2   :  { %v1465_v7 = vsel %vm1447_vm0, %v1432_v32, %v1185_v62 }
 0x1c3   :  { %v2402_v58 = vcombine.low %v1465_v7, %v1467_v30 }
 0x1c4   :  { %v885_v13 = vpop.permute.xlu1 %884 }
 0x1c5   :  { %v883_v20 = vpop.permute.xlu0 %882  ;;  %2559 = vmatprep.mubr.msk.bf16.mxu1 %vm1540_vm1, %v2402_v58  ;;  %v1242_v27 = vsel %vm1200_vm9, %v4620_v17, %v885_v13 }
 0x1c6   :  { %v1239_v39 = vsel %vm1200_vm9, %v4619_v23, %v883_v20 }
 0x1c8   :  { %v1191_v11 = vpop.permute.xlu1 %1190 }
 0x1c9   :  { %v1189_v35 = vpop.permute.xlu0 %1188  ;;  %v1471_v45 = vsel %vm1447_vm0, %v1438_v19, %v1191_v11 }
 0x1ca   :  { %v1469_v4 = vsel %vm1447_vm0, %v1436_v5, %v1189_v35 }
 0x1cb   :  { %v2403_v47 = vcombine.low %v1469_v4, %v1471_v45 }
 0x1cc   :  { %v889_v59 = vpop.permute.xlu1 %888 }
 0x1cd   :  { %v887_v22 = vpop.permute.xlu0 %886  ;;  %2560 = vmatmul.mubr.msk.bf16.vlgmr.msra.gmra.mrb[0].mxu1 %vm1540_vm1, %v2403_v47  ;;  %v1248_v30 = vsel %vm1200_vm9, %v3338_v18, %v889_v59 }
 0x1ce   :  { %v1245_v7 = vsel %vm1200_vm9, %v3336_v60, %v887_v22 }
 0x1d0   :  { %v933_v54 = vpop.permute.xlu1 %932 }
 0x1d1   :  { %v931_v8 = vpop.permute.xlu0 %930  ;;  %v1277_v12 = vsel %vm1249_vm10, %v1242_v27, %v933_v54 }
 0x1d2   :  { %v1275_v31 = vsel %vm1249_vm10, %v1239_v39, %v931_v8 }
 0x1d4   :  { %v937_v9 = vpop.permute.xlu1 %936 }
 0x1d5   :  { %v935_v1 = vpop.permute.xlu0 %934  ;;  %v1281_v38 = vsel %vm1249_vm10, %v1248_v30, %v937_v9 }
 0x1d6   :  { %v1279_v24 = vsel %vm1249_vm10, %v1245_v7, %v935_v1 }
 0x1d8   :  { %v985_v28 = vpop.permute.xlu1 %984 }
 0x1d9   :  { %v983_v48 = vpop.permute.xlu0 %982  ;;  %v1310_v53 = vsel %vm1282_vm11, %v1277_v12, %v985_v28 }
 0x1da   :  { %v1308_v14 = vsel %vm1282_vm11, %v1275_v31, %v983_v48 }
 0x1dc   :  { %v989_v10 = vpop.permute.xlu1 %988 }
 0x1dd   :  { %v987_v15 = vpop.permute.xlu0 %986  ;;  %v1314_v3 = vsel %vm1282_vm11, %v1281_v38, %v989_v10  ;;  %v1925_v38 = vld [vmem:[%s4585_s4 + $0x50] sm:$0x1] }
 0x1de   :  { %v1312_v2 = vsel %vm1282_vm11, %v1279_v24, %v987_v15  ;;  %v1922_v24 = vld [vmem:[%s4585_s4 + $0x48] sm:$0x1] }
 0x1e0   :  { %v1037_v51 = vpop.permute.xlu1 %1036 }
 0x1e1   :  { %v1035_v40 = vpop.permute.xlu0 %1034  ;;  %v1343_v36 = vsel %vm1315_vm12, %v1310_v53, %v1037_v51 }
 0x1e2   :  { %v1341_v62 = vsel %vm1315_vm12, %v1308_v14, %v1035_v40 }
 0x1e4   :  { %v1041_v63 = vpop.permute.xlu1 %1040 }
 0x1e5   :  { %v1039_v52 = vpop.permute.xlu0 %1038  ;;  %v1347_v21 = vsel %vm1315_vm12, %v1314_v3, %v1041_v63 }
 0x1e6   :  { %v1345_v13 = vsel %vm1315_vm12, %v1312_v2, %v1039_v52  ;;  %v1901_v2 = vld [vmem:[%s4585_s4 + $0x10] sm:$0x1] }
 0x1e8   :  { %v1071_v49 = vpop.permute.xlu1 %1070 }
 0x1e9   :  { %v1069_v6 = vpop.permute.xlu0 %1068  ;;  %v1376_v57 = vsel %vm1348_vm13, %v1343_v36, %v1071_v49 }
 0x1ea   :  { %v1374_v37 = vsel %vm1348_vm13, %v1341_v62, %v1069_v6 }
 0x1ec   :  { %v1075_v25 = vpop.permute.xlu1 %1074 }
 0x1ed   :  { %v1073_v26 = vpop.permute.xlu0 %1072  ;;  %v1380_v16 = vsel %vm1348_vm13, %v1347_v21, %v1075_v25  ;;  %v1907_v21 = vld [vmem:[%s4585_s4 + $0x20] sm:$0x1] }
 0x1ee   :  { %v1378_v61 = vsel %vm1348_vm13, %v1345_v13, %v1073_v26 }
 0x1f0   :  { %v1109_v0 = vpop.permute.xlu1 %1108 }
 0x1f1   :  { %v1107_v33 = vpop.permute.xlu0 %1106  ;;  %v1409_v46 = vsel %vm1381_vm14, %v1376_v57, %v1109_v0  ;;  %v1895_v57 = vld [vmem:[%s4585_s4] sm:$0x1] }
 0x1f2   :  { %v1407_v58 = vsel %vm1381_vm14, %v1374_v37, %v1107_v33  ;;  %v1896_v3 = vsel %vm3714_vm6, 0, %v1895_v57 }
 0x1f3   :  { %1897 = vst [vmem:[%s4585_s4] sm:$0x1] %v1896_v3 }
 0x1f4   :  { %v1113_v42 = vpop.permute.xlu1 %1112 }
 0x1f5   :  { %v1111_v50 = vpop.permute.xlu0 %1110  ;;  %v1413_v19 = vsel %vm1381_vm14, %v1380_v16, %v1113_v42  ;;  %v1908_v16 = vsel %vm3714_vm6, 0, %v1907_v21  ;;  %v1990_v21 = vld [vmem:[%s4585_s4 + $0x5c] sm:$0x1] }
 0x1f6   :  { %v1411_v5 = vsel %vm1381_vm14, %v1378_v61, %v1111_v50  ;;  %v1952_v61 = vld [vmem:[%s4585_s4 + $0x98] sm:$0x1]  ;;  %1909 = vst [vmem:[%s4585_s4 + $0x20] sm:$0x1] %v1908_v16  ;;  %v1996_v16 = vld [vmem:[%s4585_s4 + $0x6c] sm:$0x1] }
 0x1f8   :  { %v1161_v43 = vpop.permute.xlu1 %1160 }
 0x1f9   :  { %v1159_v41 = vpop.permute.xlu0 %1158  ;;  %v1442_v18 = vsel %vm1414_vm15, %v1409_v46, %v1161_v43  ;;  %v4621_v43 = vmov 0   ;;  %v1898_v46 = vld [vmem:[%s4585_s4 + $0x8] sm:$0x1] }
 0x1fa   :  { %v1440_v60 = vsel %vm1414_vm15, %v1407_v58, %v1159_v41  ;;  %v2707_v41 = vmov 0.0   ;;  %1884 = vst.msk [vmem:[%s4585_s4 + $0x4] sm:$0x1] %vm624_vm5, %v4621_v43  ;;  %1886 = vst.msk [vmem:[%s4585_s4 + $0x54] sm:$0x1] %vm624_vm5, %v4621_v43 }
 0x1fb   :  { %625 = vst.msk [vmem:[#allocation5] sm:$0x1] %vm624_vm5, %v2707_v41  ;;  %2419 = vst.msk [vmem:[%s4585_s4 + $0x4c] sm:$0x1] %vm624_vm5, %v4621_v43 }
 0x1fc   :  { %v1165_v55 = vpop.permute.xlu1 %1164  ;;  %2421 = vst.msk [vmem:[%s4585_s4 + $0x9c] sm:$0x1] %vm624_vm5, %v4621_v43  ;;  %v1960_v43 = vld [vmem:[%s4585_s4 + $0xc] sm:$0x1] }
 0x1fd   :  { %v1163_v32 = vpop.permute.xlu0 %1162  ;;  %v1446_v11 = vsel %vm1414_vm15, %v1413_v19, %v1165_v55  ;;  %v1916_v19 = vld [vmem:[%s4585_s4 + $0x38] sm:$0x1] }
 0x1fe   :  { %v1444_v35 = vsel %vm1414_vm15, %v1411_v5, %v1163_v32  ;;  %v1913_v5 = vld [vmem:[%s4585_s4 + $0x30] sm:$0x1] }
 0x200   :  { %v1195_v20 = vpop.permute.xlu1 %1194 }
 0x201   :  { %v1193_v29 = vpop.permute.xlu0 %1192  ;;  %v1475_v44 = vsel %vm1447_vm0, %v1442_v18, %v1195_v20  ;;  %v1902_v18 = vsel %vm3714_vm6, 0, %v1901_v2  ;;  %v1923_v20 = vsel %vm3714_vm6, 0, %v1922_v24  ;;  %v1978_v24 = vld [vmem:[%s4585_s4 + $0x3c] sm:$0x1] }
 0x202   :  { %v1473_v56 = vsel %vm1447_vm0, %v1440_v60, %v1193_v29  ;;  %v1899_v60 = vsel %vm3714_vm6, 0, %v1898_v46  ;;  %v1904_v29 = vld [vmem:[%s4585_s4 + $0x18] sm:$0x1]  ;;  %1903 = vst [vmem:[%s4585_s4 + $0x10] sm:$0x1] %v1902_v18  ;;  %v1979_v2 = vsel %vm3857_vm3, 0, %v1978_v24 }
 0x203   :  { %v2404_v34 = vcombine.low %v1473_v56, %v1475_v44  ;;  %1900 = vst [vmem:[%s4585_s4 + $0x8] sm:$0x1] %v1899_v60  ;;  %v1905_v13 = vsel %vm3714_vm6, 0, %v1904_v29  ;;  %v1910_v56 = vld [vmem:[%s4585_s4 + $0x28] sm:$0x1]  ;;  %v1926_v44 = vsel %vm3714_vm6, 0, %v1925_v38 }
 0x204   :  { %v1199_v45 = vpop.permute.xlu1 %1198  ;;  %1924 = vst [vmem:[%s4585_s4 + $0x48] sm:$0x1] %v1923_v20  ;;  %1906 = vst [vmem:[%s4585_s4 + $0x18] sm:$0x1] %v1905_v13  ;;  %v1981_v38 = vld [vmem:[%s4585_s4 + $0x44] sm:$0x1] }
 0x205   :  { %v1197_v4 = vpop.permute.xlu0 %1196  ;;  %2563 = vmatprep.mubr.msk.bf16.mxu1 %vm1540_vm1, %v2404_v34  ;;  %v1479_v22 = vsel %vm1447_vm0, %v1446_v11, %v1199_v45  ;;  %v1911_v34 = vsel %vm3714_vm6, 0, %v1910_v56  ;;  %1927 = vst [vmem:[%s4585_s4 + $0x50] sm:$0x1] %v1926_v44  ;;  %v1917_v11 = vsel %vm3714_vm6, 0, %v1916_v19  ;;  %v1928_v45 = vld [vmem:[%s4585_s4 + $0x58] sm:$0x1] }
 0x206   :  { %v1477_v47 = vsel %vm1447_vm0, %v1444_v35, %v1197_v4  ;;  %1912 = vst [vmem:[%s4585_s4 + $0x28] sm:$0x1] %v1911_v34  ;;  %v1914_v35 = vsel %vm3714_vm6, 0, %v1913_v5  ;;  %v1919_v4 = vld [vmem:[%s4585_s4 + $0x40] sm:$0x1]  ;;  %v1982_v3 = vsel %vm3857_vm3, 0, %v1981_v38 }
 0x207   :  { %v2405_v59 = vcombine.low %v1477_v47, %v1479_v22  ;;  %1915 = vst [vmem:[%s4585_s4 + $0x30] sm:$0x1] %v1914_v35  ;;  %1918 = vst [vmem:[%s4585_s4 + $0x38] sm:$0x1] %v1917_v11  ;;  %v1920_v47 = vsel %vm3714_vm6, 0, %v1919_v4  ;;  %v1929_v22 = vsel %vm3714_vm6, 0, %v1928_v45 }
 0x208   :  { %1921 = vst [vmem:[%s4585_s4 + $0x40] sm:$0x1] %v1920_v47  ;;  %1930 = vst [vmem:[%s4585_s4 + $0x58] sm:$0x1] %v1929_v22  ;;  %v1984_v60 = vld [vmem:[%s4585_s4 + $0x4c] sm:$0x1] }
 0x209   :  { %2564 = vmatmul.mubr.msk.bf16.gmra.mrb[4].mxu1 %vm1540_vm1, %v2405_v59  ;;  %v1931_v59 = vld [vmem:[%s4585_s4 + $0x60] sm:$0x1]  ;;  %v1987_v18 = vld [vmem:[%s4585_s4 + $0x54] sm:$0x1]  ;;  %1980 = vst [vmem:[%s4585_s4 + $0x3c] sm:$0x1] %v1979_v2 }
 0x20a   :  { %1983 = vst [vmem:[%s4585_s4 + $0x44] sm:$0x1] %v1982_v3  ;;  %v1985_v20 = vsel %vm3857_vm3, 0, %v1984_v60  ;;  %v1988_v13 = vsel %vm3857_vm3, 0, %v1987_v18  ;;  %v1991_v44 = vsel %vm3857_vm3, 0, %v1990_v21  ;;  %v1997_v5 = vsel %vm3857_vm3, 0, %v1996_v16 }
 0x20b   :  { %1986 = vst [vmem:[%s4585_s4 + $0x4c] sm:$0x1] %v1985_v20  ;;  %1989 = vst [vmem:[%s4585_s4 + $0x54] sm:$0x1] %v1988_v13  ;;  %v1999_v19 = vld [vmem:[%s4585_s4 + $0x74] sm:$0x1] }
 0x20c   :  { %1992 = vst [vmem:[%s4585_s4 + $0x5c] sm:$0x1] %v1991_v44  ;;  %1998 = vst [vmem:[%s4585_s4 + $0x6c] sm:$0x1] %v1997_v5  ;;  %v2000_v11 = vsel %vm3857_vm3, 0, %v1999_v19 }
 0x20d   :  { %v2002_v4 = vld [vmem:[%s4585_s4 + $0x7c] sm:$0x1]  ;;  %2001 = vst [vmem:[%s4585_s4 + $0x74] sm:$0x1] %v2000_v11  ;;  %v2005_v47 = vld [vmem:[%s4585_s4 + $0x84] sm:$0x1] }
 0x20e   :  { %v2003_v45 = vsel %vm3857_vm3, 0, %v2002_v4  ;;  %v2008_v22 = vld [vmem:[%s4585_s4 + $0x8c] sm:$0x1] }
 0x20f   :  { %2004 = vst [vmem:[%s4585_s4 + $0x7c] sm:$0x1] %v2003_v45 }
 0x249   :  { %v2553_v8 = vpop.f32.mrb[0].mxu0 }
 0x24a   :  { %1668 = vst.msk [vmem:[#allocation4 + $0x10] sm:$0xff] %vm1249_vm10, %v2553_v8  ;;  %v1603_v54 = vpop.f32.mrb[1].mxu0  ;;  %v1686_v10 = vsel %vm1249_vm10, %v2553_v8, 0.0  ;;  %v1934_v8 = vld [vmem:[%s4585_s4 + $0x68] sm:$0x1] }
 0x24b   :  { %1666 = vst.msk [vmem:[#allocation4] sm:$0xff] %vm1249_vm10, %v1603_v54  ;;  %v2554_v1 = vpop.f32.mrb[2].mxu0  ;;  %v1683_v48 = vsel %vm1249_vm10, %v1603_v54, 0.0  ;;  %v1932_v54 = vsel %vm3714_vm6, 0, %v1931_v59 }
 0x24c   :  { %1669 = vst.msk [vmem:[#allocation4 + $0x18] sm:$0xff] %vm1249_vm10, %v2554_v1  ;;  %v1606_v9 = vpop.f32.mrb[3].mxu0  ;;  %v1688_v51 = vsel %vm1249_vm10, %v2554_v1, 0.0  ;;  %v1935_v1 = vsel %vm3714_vm6, 0, %v1934_v8  ;;  %1933 = vst [vmem:[%s4585_s4 + $0x60] sm:$0x1] %v1932_v54 }
 0x24d   :  { %1667 = vst.msk [vmem:[#allocation4 + $0x8] sm:$0xff] %vm1249_vm10, %v1606_v9  ;;  %v1684_v28 = vsel %vm1249_vm10, %v1606_v9, 0.0  ;;  %v1937_v9 = vld [vmem:[%s4585_s4 + $0x70] sm:$0x1]  ;;  %1936 = vst [vmem:[%s4585_s4 + $0x68] sm:$0x1] %v1935_v1 }
 0x24e   :  { %v1685_v15 = vadd.f32 %v1684_v28, %v1683_v48  ;;  %v1940_v48 = vld [vmem:[%s4585_s4 + $0x78] sm:$0x1]  ;;  %v1938_v28 = vsel %vm3714_vm6, 0, %v1937_v9  ;;  %v2006_v8 = vsel %vm3857_vm3, 0, %v2005_v47  ;;  %v2009_v54 = vsel %vm3857_vm3, 0, %v2008_v22 }
 0x24f   :  { %1939 = vst [vmem:[%s4585_s4 + $0x70] sm:$0x1] %v1938_v28  ;;  %v2011_v1 = vld [vmem:[%s4585_s4 + $0x94] sm:$0x1]  ;;  %v2014_v9 = vld [vmem:[%s4585_s4 + $0x9c] sm:$0x1] }
 0x250   :  { %v1687_v40 = vadd.f32 %v1686_v10, %v1685_v15  ;;  %v1941_v15 = vsel %vm3714_vm6, 0, %v1940_v48  ;;  %v1943_v10 = vld [vmem:[%s4585_s4 + $0x80] sm:$0x1]  ;;  %2007 = vst [vmem:[%s4585_s4 + $0x84] sm:$0x1] %v2006_v8  ;;  %v2012_v48 = vsel %vm3857_vm3, 0, %v2011_v1 }
 0x251   :  { %1942 = vst [vmem:[%s4585_s4 + $0x78] sm:$0x1] %v1941_v15  ;;  %2010 = vst [vmem:[%s4585_s4 + $0x8c] sm:$0x1] %v2009_v54  ;;  %v2015_v28 = vsel %vm3857_vm3, 0, %v2014_v9 }
 0x252   :  { %v1689_v52 = vadd.f32 %v1688_v51, %v1687_v40  ;;  %v1946_v40 = vld [vmem:[%s4585_s4 + $0x88] sm:$0x1]  ;;  %2013 = vst [vmem:[%s4585_s4 + $0x94] sm:$0x1] %v2012_v48  ;;  %2016 = vst [vmem:[%s4585_s4 + $0x9c] sm:$0x1] %v2015_v28 }
 0x261   :  { %v2557_v63 = vpop.f32.mrb[4].mxu0 }
 0x262   :  { %1672 = vst.msk [vmem:[#allocation4 + $0x30] sm:$0xff] %vm1249_vm10, %v2557_v63  ;;  %v1619_v6 = vpop.f32.mrb[5].mxu0  ;;  %v1694_v42 = vsel %vm1249_vm10, %v2557_v63, 0.0  ;;  %v1947_v63 = vsel %vm3714_vm6, 0, %v1946_v40 }
 0x263   :  { %1670 = vst.msk [vmem:[#allocation4 + $0x20] sm:$0xff] %vm1249_vm10, %v1619_v6  ;;  %v1690_v49 = vsel %vm1249_vm10, %v1619_v6, 0.0  ;;  %v2558_v26 = vpop.f32.mrb[6].mxu0  ;;  %v1949_v6 = vld [vmem:[%s4585_s4 + $0x90] sm:$0x1] }
 0x264   :  { %v1691_v25 = vadd.f32 %v1690_v49, %v1689_v52  ;;  %1673 = vst.msk [vmem:[#allocation4 + $0x38] sm:$0xff] %vm1249_vm10, %v2558_v26  ;;  %v1622_v33 = vpop.f32.mrb[7].mxu0  ;;  %v1696_v39 = vsel %vm1249_vm10, %v2558_v26, 0.0  ;;  %v1944_v52 = vsel %vm3714_vm6, 0, %v1943_v10  ;;  %v1953_v49 = vsel %vm3714_vm6, 0, %v1952_v61 }
 0x265   :  { %1671 = vst.msk [vmem:[#allocation4 + $0x28] sm:$0xff] %vm1249_vm10, %v1622_v33  ;;  %v1692_v0 = vsel %vm1249_vm10, %v1622_v33, 0.0  ;;  %1945 = vst [vmem:[%s4585_s4 + $0x80] sm:$0x1] %v1944_v52  ;;  %v1950_v33 = vsel %vm3714_vm6, 0, %v1949_v6  ;;  %v1741_v6 = vlaneseq }
 0x266   :  { %v1693_v50 = vadd.f32 %v1692_v0, %v1691_v25  ;;  %1948 = vst [vmem:[%s4585_s4 + $0x88] sm:$0x1] %v1947_v63  ;;  %1954 = vst [vmem:[%s4585_s4 + $0x98] sm:$0x1] %v1953_v49  ;;  %v1957_v0 = vld [vmem:[%s4585_s4 + $0x4] sm:$0x1] }
 0x267   :  { %1951 = vst [vmem:[%s4585_s4 + $0x90] sm:$0x1] %v1950_v33  ;;  %v1958_v41 = vsel %vm3857_vm3, 0, %v1957_v0  ;;  %v1993_v61 = vld [vmem:[%s4585_s4 + $0x64] sm:$0x1]  ;;  %v4045_v49 = vshrl.u32 %v1741_v6, 7 }
 0x268   :  { %v1695_v23 = vadd.f32 %v1694_v42, %v1693_v50  ;;  %1959 = vst [vmem:[%s4585_s4 + $0x4] sm:$0x1] %v1958_v41  ;;  %v1994_v34 = vsel %vm3857_vm3, 0, %v1993_v61 }
 0x269   :  { %1995 = vst [vmem:[%s4585_s4 + $0x64] sm:$0x1] %v1994_v34  ;;  %v1743_v26 = vsub.s32 0, %v4045_v49  ;;  %v2417_v49 = vld [vmem:[%s4584_s3] ss:$0 sm:$0xff] }
 0x26a   :  { %v1697_v17 = vadd.f32 %v1696_v39, %v1695_v23 }
 0x26b   :  { %v1731_v2 = vld [vmem:[#allocation4 + $0x38] sm:$0xff] }
 0x2a0   :  { %v2561_v27 = vpop.f32.mrb[0].mxu1 }
 0x2a1   :  { %1676 = vst.msk [vmem:[#allocation4 + $0x50] sm:$0xff] %vm1249_vm10, %v2561_v27  ;;  %v1635_v31 = vpop.f32.mrb[1].mxu1  ;;  %v1702_v36 = vsel %vm1249_vm10, %v2561_v27, 0.0  ;;  %v1961_v27 = vsel %vm3857_vm3, 0, %v1960_v43 }
 0x2a2   :  { %1674 = vst.msk [vmem:[#allocation4 + $0x40] sm:$0xff] %vm1249_vm10, %v1635_v31  ;;  %v1698_v12 = vsel %vm1249_vm10, %v1635_v31, 0.0  ;;  %v2562_v14 = vpop.f32.mrb[2].mxu1  ;;  %v1963_v31 = vld [vmem:[%s4585_s4 + $0x14] sm:$0x1] }
 0x2a3   :  { %v1699_v53 = vadd.f32 %v1698_v12, %v1697_v17  ;;  %1677 = vst.msk [vmem:[#allocation4 + $0x58] sm:$0xff] %vm1249_vm10, %v2562_v14  ;;  %v1638_v32 = vpop.f32.mrb[3].mxu1  ;;  %v1704_v30 = vsel %vm1249_vm10, %v2562_v14, 0.0  ;;  %1962 = vst [vmem:[%s4585_s4 + $0xc] sm:$0x1] %v1961_v27  ;;  %v1964_v14 = vsel %vm3857_vm3, 0, %v1963_v31 }
 0x2a4   :  { %1675 = vst.msk [vmem:[#allocation4 + $0x48] sm:$0xff] %vm1249_vm10, %v1638_v32  ;;  %v1700_v55 = vsel %vm1249_vm10, %v1638_v32, 0.0  ;;  %v1969_v32 = vld [vmem:[%s4585_s4 + $0x24] sm:$0x1]  ;;  %1965 = vst [vmem:[%s4585_s4 + $0x14] sm:$0x1] %v1964_v14 }
 0x2a5   :  { %v1701_v62 = vadd.f32 %v1700_v55, %v1699_v53  ;;  %v1966_v53 = vld [vmem:[%s4585_s4 + $0x1c] sm:$0x1]  ;;  %v1728_v14 = vld [vmem:[#allocation4 + $0x20] sm:$0xff] }
 0x2a7   :  { %v1703_v7 = vadd.f32 %v1702_v36, %v1701_v62  ;;  %v1967_v62 = vsel %vm3857_vm3, 0, %v1966_v53  ;;  %v1970_v36 = vsel %vm3857_vm3, 0, %v1969_v32 }
 0x2a8   :  { %1968 = vst [vmem:[%s4585_s4 + $0x1c] sm:$0x1] %v1967_v62  ;;  %1971 = vst [vmem:[%s4585_s4 + $0x24] sm:$0x1] %v1970_v36 }
 0x2a9   :  { %v3701_v37 = vadd.f32 %v1704_v30, %v1703_v7  ;;  %v1972_v7 = vld [vmem:[%s4585_s4 + $0x2c] sm:$0x1]  ;;  %v1975_v30 = vld [vmem:[%s4585_s4 + $0x34] sm:$0x1]  ;;  %v1732_v20 = vld [vmem:[#allocation4 + $0x40] sm:$0xff] }
 0x2aa   :  { %v1976_v57 = vsel %vm3857_vm3, 0, %v1975_v30  ;;  %v1735_v22 = vld [vmem:[#allocation4 + $0x58] sm:$0xff] }
 0x2ab   :  { %1977 = vst [vmem:[%s4585_s4 + $0x34] sm:$0x1] %v1976_v57  ;;  %v1733_v61 = vld [vmem:[#allocation4 + $0x48] sm:$0xff] }
 0x2dc   :  { %v2565_v51 = vpop.f32.mrb[4].mxu1 }
 0x2dd   :  { %1680 = vst.msk [vmem:[#allocation4 + $0x70] sm:$0xff] %vm1249_vm10, %v2565_v51  ;;  %v1651_v25 = vpop.f32.mrb[5].mxu1  ;;  %v1710_v23 = vsel %vm1249_vm10, %v2565_v51, 0.0  ;;  %v1682_v51 = vld [vmem:[#allocation5] sm:$0x1] }
 0x2de   :  { %1678 = vst.msk [vmem:[#allocation4 + $0x60] sm:$0xff] %vm1249_vm10, %v1651_v25  ;;  %v1706_v50 = vsel %vm1249_vm10, %v1651_v25, 0.0  ;;  %v2566_v42 = vpop.f32.mrb[6].mxu1 }
 0x2df   :  { %v1707_v39 = vadd.f32 %v1706_v50, %v3701_v37  ;;  %1681 = vst.msk [vmem:[#allocation4 + $0x78] sm:$0xff] %vm1249_vm10, %v2566_v42  ;;  %v1654_v17 = vpop.f32.mrb[7].mxu1  ;;  %v1973_v37 = vsel %vm3857_vm3, 0, %v1972_v7  ;;  %v1712_v29 = vsel %vm1249_vm10, %v2566_v42, 0.0  ;;  %v1724_v50 = vld [vmem:[#allocation4] sm:$0xff]  ;;  %v1725_v42 = vld [vmem:[#allocation4 + $0x8] sm:$0xff] }
 0x2e0   :  { %1679 = vst.msk [vmem:[#allocation4 + $0x68] sm:$0xff] %vm1249_vm10, %v1654_v17  ;;  %v1708_v12 = vsel %vm1249_vm10, %v1654_v17, 0.0  ;;  %1974 = vst [vmem:[%s4585_s4 + $0x2c] sm:$0x1] %v1973_v37  ;;  %v1727_v17 = vld [vmem:[#allocation4 + $0x18] sm:$0xff]  ;;  %v1730_v37 = vld [vmem:[#allocation4 + $0x30] sm:$0xff] }
 0x2e1   :  { %v1709_v55 = vadd.f32 %v1708_v12, %v1707_v39 }
 0x2e3   :  { %v1711_v46 = vadd.f32 %v1710_v23, %v1709_v55  ;;  %v1726_v23 = vld [vmem:[#allocation4 + $0x10] sm:$0xff]  ;;  %v1729_v55 = vld [vmem:[#allocation4 + $0x28] sm:$0xff] }
 0x2e5   :  { %v1713_v56 = vadd.f32 %v1712_v29, %v1711_v46  ;;  %v1736_v9 = vld [vmem:[#allocation4 + $0x60] sm:$0xff] }
 0x2e7   :  { %v1714_v35 = vrot.slane %v1713_v56, 4 }
 0x2e9   :  { %v1715_v59 = vadd.f32 %v1714_v35, %v1713_v56  ;;  %v1734_v35 = vld [vmem:[#allocation4 + $0x50] sm:$0xff] }
 0x2eb   :  { %v1716_v15 = vrot.slane %v1715_v59, 2 }
 0x2ed   :  { %v1717_v10 = vadd.f32 %v1716_v15, %v1715_v59 }
 0x2ef   :  { %v1718_v40 = vrot.slane %v1717_v10, 1 }
 0x2f1   :  { %v1719_v52 = vadd.f32 %v1718_v40, %v1717_v10  ;;  %v1737_v40 = vld [vmem:[#allocation4 + $0x68] sm:$0xff] }
 0x2f3   :  { %v1720_v63 = vadd.f32 %v1719_v52, %v1682_v51 }
 0x2f5   :  { %1721 = vst.msk [vmem:[#allocation5] sm:$0x1] %vm624_vm5, %v1720_v63 }
 0x2fc   :  { %v1722_v25 = vld [vmem:[#allocation5] sm:$0x1] }
 0x2fd   :  { %v1723_v33 = vmul.f32 0.0078125, %v1722_v25  ;;  %v1738_v25 = vld [vmem:[#allocation4 + $0x70] sm:$0xff] }
 0x2ff   :  { %v4050_v0 = vrot.slane %v1723_v33, %v1743_v26 }
 0x301   :  { %v4053_v41 = vsub.f32 %v1724_v50, %v4050_v0  ;;  %v4056_v43 = vsub.f32 %v1725_v42, %v4050_v0  ;;  %v4059_v39 = vsub.f32 %v1726_v23, %v4050_v0  ;;  %v4062_v27 = vsub.f32 %v1727_v17, %v4050_v0  ;;  %v1739_v17 = vld [vmem:[#allocation4 + $0x78] sm:$0xff] }
 0x302   :  { %v4069_v53 = vsub.f32 %v1728_v14, %v4050_v0  ;;  %v4074_v62 = vsub.f32 %v1729_v55, %v4050_v0  ;;  %v4081_v24 = vsub.f32 %v1730_v37, %v4050_v0  ;;  %v4087_v60 = vsub.f32 %v1731_v2, %v4050_v0 }
 0x303   :  { %v1762_v31 = vmul.f32 %v4053_v41, %v4053_v41  ;;  %v1763_v12 = vmul.f32 %v4056_v43, %v4056_v43  ;;  %v1764_v32 = vmul.f32 %v4059_v39, %v4059_v39  ;;  %v1765_v36 = vmul.f32 %v4062_v27, %v4062_v27 }
 0x304   :  { %v1766_v38 = vmul.f32 %v4069_v53, %v4069_v53  ;;  %v1767_v18 = vmul.f32 %v4074_v62, %v4074_v62  ;;  %v4093_v21 = vsub.f32 %v1732_v20, %v4050_v0  ;;  %v1768_v56 = vmul.f32 %v4081_v24, %v4081_v24 }
 0x305   :  { %v1778_v7 = vsel %vm1249_vm10, %v1762_v31, 0.0  ;;  %v1779_v30 = vsel %vm1249_vm10, %v1763_v12, 0.0  ;;  %v1781_v46 = vsel %vm1249_vm10, %v1764_v32, 0.0  ;;  %v1783_v29 = vsel %vm1249_vm10, %v1765_v36, 0.0 }
 0x306   :  { %v1780_v57 = vadd.f32 %v1779_v30, %v1778_v7  ;;  %v1785_v44 = vsel %vm1249_vm10, %v1766_v38, 0.0  ;;  %v4099_v34 = vsub.f32 %v1733_v61, %v4050_v0  ;;  %v1769_v5 = vmul.f32 %v4087_v60, %v4087_v60 }
 0x307   :  { %v1787_v19 = vsel %vm1249_vm10, %v1767_v18, 0.0  ;;  %v4105_v4 = vsub.f32 %v1734_v35, %v4050_v0  ;;  %v1770_v45 = vmul.f32 %v4093_v21, %v4093_v21  ;;  %v1789_v47 = vsel %vm1249_vm10, %v1768_v56, 0.0 }
 0x308   :  { %v1782_v3 = vadd.f32 %v1781_v46, %v1780_v57  ;;  %v1757_v8 = vsub.f32 %v1735_v22, %v4050_v0  ;;  %v1771_v54 = vmul.f32 %v4099_v34, %v4099_v34  ;;  %v1791_v1 = vsel %vm1249_vm10, %v1769_v5, 0.0 }
 0x309   :  { %v1758_v28 = vsub.f32 %v1736_v9, %v4050_v0  ;;  %v1772_v15 = vmul.f32 %v4105_v4, %v4105_v4  ;;  %v1793_v10 = vsel %vm1249_vm10, %v1770_v45, 0.0  ;;  %v1759_v52 = vsub.f32 %v1737_v40, %v4050_v0 }
 0x30a   :  { %v1784_v13 = vadd.f32 %v1783_v29, %v1782_v3  ;;  %v1773_v63 = vmul.f32 %v1757_v8, %v1757_v8  ;;  %v1795_v6 = vsel %vm1249_vm10, %v1771_v54, 0.0  ;;  %v1760_v50 = vsub.f32 %v1738_v25, %v4050_v0 }
 0x30b   :  { %v1774_v42 = vmul.f32 %v1758_v28, %v1758_v28  ;;  %v1797_v23 = vsel %vm1249_vm10, %v1772_v15, 0.0  ;;  %v1761_v12 = vsub.f32 %v1739_v17, %v4050_v0  ;;  %v1775_v14 = vmul.f32 %v1759_v52, %v1759_v52 }
 0x30c   :  { %v1786_v16 = vadd.f32 %v1785_v44, %v1784_v13  ;;  %v1799_v32 = vsel %vm1249_vm10, %v1773_v63, 0.0  ;;  %v1776_v36 = vmul.f32 %v1760_v50, %v1760_v50 }
 0x30d   :  { %v1801_v7 = vsel %vm1249_vm10, %v1774_v42, 0.0  ;;  %v1777_v37 = vmul.f32 %v1761_v12, %v1761_v12  ;;  %v1803_v57 = vsel %vm1249_vm10, %v1775_v14, 0.0 }
 0x30e   :  { %v1788_v11 = vadd.f32 %v1787_v19, %v1786_v16  ;;  %v1805_v46 = vsel %vm1249_vm10, %v1776_v36, 0.0  ;;  %v1817_v19 = vld [vmem:[%s4583_s2] sm:$0x1] }
 0x30f   :  { %v1807_v3 = vsel %vm1249_vm10, %v1777_v37, 0.0 }
 0x310   :  { %v1790_v59 = vadd.f32 %v1789_v47, %v1788_v11 }
 0x312   :  { %v1792_v48 = vadd.f32 %v1791_v1, %v1790_v59 }
 0x314   :  { %v1794_v51 = vadd.f32 %v1793_v10, %v1792_v48 }
 0x316   :  { %v1796_v33 = vadd.f32 %v1795_v6, %v1794_v51 }
 0x318   :  { %v1798_v31 = vadd.f32 %v1797_v23, %v1796_v33 }
 0x31a   :  { %v1800_v55 = vadd.f32 %v1799_v32, %v1798_v31 }
 0x31c   :  { %v1802_v30 = vadd.f32 %v1801_v7, %v1800_v55 }
 0x31e   :  { %v1804_v38 = vadd.f32 %v1803_v57, %v1802_v30 }
 0x320   :  { %v1806_v2 = vadd.f32 %v1805_v46, %v1804_v38 }
 0x322   :  { %v1808_v18 = vadd.f32 %v1807_v3, %v1806_v2 }
 0x324   :  { %v1809_v29 = vrot.slane %v1808_v18, 4 }
 0x326   :  { %v1810_v0 = vadd.f32 %v1809_v29, %v1808_v18 }
 0x328   :  { %v1811_v20 = vrot.slane %v1810_v0, 2 }
 0x32a   :  { %v1812_v13 = vadd.f32 %v1811_v20, %v1810_v0 }
 0x32c   :  { %v1813_v56 = vrot.slane %v1812_v13, 1 }
 0x32e   :  { %v1814_v44 = vadd.f32 %v1813_v56, %v1812_v13 }
 0x330   :  { %v1815_v61 = vmul.f32 0.0078125, %v1814_v44 }
 0x332   :  { %v1816_v16 = vmax.f32 %v1815_v61, 0.0 }
 0x334   :  { %v1818_v5 = vadd.f32 1e-05, %v1816_v16 }
 0x336   :  { %2668 = vrsqrt.f32 %v1818_v5 }
 0x340   :  { %v2669_v35 = vpop.eup %2668 }
 0x341   :  { %v1820_v11 = vmul.f32 %v2669_v35, %v1817_v19 }
 0x343   :  { %v1825_v45 = vrot.slane %v1820_v11, %v1743_v26 }
 0x345   :  { %v1827_v47 = vmul.f32 %v1825_v45, %v4053_v41  ;;  %v1828_v22 = vmul.f32 %v1825_v45, %v4056_v43  ;;  %v1829_v59 = vmul.f32 %v1825_v45, %v4059_v39  ;;  %v1830_v54 = vmul.f32 %v1825_v45, %v4062_v27 }
 0x346   :  { %v1831_v1 = vmul.f32 %v1825_v45, %v4069_v53  ;;  %v1832_v9 = vmul.f32 %v1825_v45, %v4074_v62  ;;  %v1833_v48 = vmul.f32 %v1825_v45, %v4081_v24  ;;  %v1834_v15 = vmul.f32 %v1825_v45, %v4087_v60 }
 0x347   :  { %v1835_v26 = vmul.f32 %v1825_v45, %v4093_v21  ;;  %v1836_v41 = vmul.f32 %v1825_v45, %v4099_v34  ;;  %v1837_v43 = vmul.f32 %v1825_v45, %v4105_v4  ;;  %v1838_v39 = vmul.f32 %v1825_v45, %v1757_v8 }
 0x348   :  { %v1839_v27 = vmul.f32 %v1825_v45, %v1758_v28  ;;  %v1840_v10 = vmul.f32 %v1825_v45, %v1759_v52  ;;  %v1841_v53 = vmul.f32 %v1825_v45, %v1760_v50  ;;  %v1842_v40 = vmul.f32 %v1825_v45, %v1761_v12 }
 0x349   :  { %v1850_v62 = vadd.f32 %v2417_v49, %v1827_v47  ;;  %v1851_v51 = vadd.f32 %v2417_v49, %v1828_v22  ;;  %v1852_v24 = vadd.f32 %v2417_v49, %v1829_v59  ;;  %v1853_v63 = vadd.f32 %v2417_v49, %v1830_v54 }
 0x34a   :  { %v1854_v60 = vadd.f32 %v2417_v49, %v1831_v1  ;;  %v1855_v6 = vadd.f32 %v2417_v49, %v1832_v9  ;;  %v1856_v25 = vadd.f32 %v2417_v49, %v1833_v48  ;;  %v1857_v33 = vadd.f32 %v2417_v49, %v1834_v15 }
 0x34b   :  { %v1858_v42 = vadd.f32 %v2417_v49, %v1835_v26  ;;  %v1859_v23 = vadd.f32 %v2417_v49, %v1836_v41  ;;  %v1860_v21 = vadd.f32 %v2417_v49, %v1837_v43  ;;  %v1861_v17 = vadd.f32 %v2417_v49, %v1838_v39 }
 0x34c   :  { %v1862_v34 = vadd.f32 %v2417_v49, %v1839_v27  ;;  %v1863_v31 = vadd.f32 %v2417_v49, %v1840_v10  ;;  %v1864_v4 = vadd.f32 %v2417_v49, %v1841_v53  ;;  %v1865_v8 = vadd.f32 %v2417_v49, %v1842_v40 }
 0x34d   :  { %v1866_v28 = vmax.f32 %v1850_v62, 0.0  ;;  %v1867_v52 = vmax.f32 %v1851_v51, 0.0  ;;  %v1868_v50 = vmax.f32 %v1852_v24, 0.0  ;;  %v1869_v12 = vmax.f32 %v1853_v63, 0.0 }
 0x34e   :  { %v1870_v14 = vmax.f32 %v1854_v60, 0.0  ;;  %v1871_v32 = vmax.f32 %v1855_v6, 0.0  ;;  %v1872_v55 = vmax.f32 %v1856_v25, 0.0  ;;  %v1873_v36 = vmax.f32 %v1857_v33, 0.0 }
 0x34f   :  { %v1874_v7 = vmax.f32 %v1858_v42, 0.0  ;;  %v1875_v30 = vmax.f32 %v1859_v23, 0.0  ;;  %v1876_v37 = vmax.f32 %v1860_v21, 0.0  ;;  %v1877_v57 = vmax.f32 %v1861_v17, 0.0 }
 0x350   :  { %v1878_v38 = vmax.f32 %v1862_v34, 0.0  ;;  %v1879_v46 = vmax.f32 %v1863_v31, 0.0  ;;  %v1880_v2 = vmax.f32 %v1864_v4, 0.0  ;;  %v1881_v3 = vmax.f32 %v1865_v8, 0.0 }
 0x351   :  { %v2518_v18 = vpack.c.bf16 %v1866_v28, %v1866_v28  ;;  %v2519_v29 = vpack.c.bf16 %v1867_v52, %v1867_v52  ;;  %v2520_v0 = vpack.c.bf16 %v1868_v50, %v1868_v50  ;;  %v2521_v20 = vpack.c.bf16 %v1869_v12, %v1869_v12 }
 0x352   :  { %v2522_v13 = vpack.c.bf16 %v1870_v14, %v1870_v14  ;;  %v2523_v56 = vpack.c.bf16 %v1871_v32, %v1871_v32  ;;  %v2524_v44 = vpack.c.bf16 %v1872_v55, %v1872_v55  ;;  %v2525_v61 = vpack.c.bf16 %v1873_v36, %v1873_v36 }
 0x353   :  { %v2526_v16 = vpack.c.bf16 %v1874_v7, %v1874_v7  ;;  %v4147_v5 = vpack.c.bf16 %v1875_v30, %v1875_v30  ;;  %v4149_v19 = vpack.c.bf16 %v1876_v37, %v1876_v37  ;;  %v4151_v35 = vpack.c.bf16 %v1877_v57, %v1877_v57 }
 0x354   :  { %v4153_v11 = vpack.c.bf16 %v1878_v38, %v1878_v38  ;;  %v4155_v45 = vpack.c.bf16 %v1879_v46, %v1879_v46  ;;  %v4157_v47 = vpack.c.bf16 %v1880_v2, %v1880_v2  ;;  %v4159_v22 = vpack.c.bf16 %v1881_v3, %v1881_v3 }
 0x355   :  { %v2082_v59 = vshrl.u32 %v2518_v18, 16  ;;  %v2085_v54 = vshll.u32 %v2518_v18, 16  ;;  %v2090_v1 = vshrl.u32 %v2519_v29, 16  ;;  %v2093_v9 = vshll.u32 %v2519_v29, 16 }
 0x356   :  { %v2098_v48 = vshrl.u32 %v2520_v0, 16  ;;  %v2101_v15 = vshll.u32 %v2520_v0, 16  ;;  %v2106_v49 = vshrl.u32 %v2521_v20, 16  ;;  %v2109_v26 = vshll.u32 %v2521_v20, 16 }
 0x357   :  { %v4161_v41 = vrot.slane %v2082_v59, 7  ;;  %v4163_v43 = vrot.slane %v2090_v1, 7  ;;  %v2114_v39 = vshrl.u32 %v2522_v13, 16  ;;  %v2117_v27 = vshll.u32 %v2522_v13, 16 }
 0x358   :  { %v4165_v10 = vrot.slane %v2098_v48, 7  ;;  %v4167_v53 = vrot.slane %v2106_v49, 7  ;;  %v2122_v40 = vshrl.u32 %v2523_v56, 16  ;;  %v2125_v62 = vshll.u32 %v2523_v56, 16 }
 0x359   :  { %v4170_v51 = vor.u32 %v2085_v54, %v4161_v41  ;;  %v2088_v24 = vrot.slane %v4161_v41, 4  ;;  %v4174_v63 = vor.u32 %v2093_v9, %v4163_v43  ;;  %v2096_v60 = vrot.slane %v4163_v43, 4 }
 0x35a   :  { %v4178_v6 = vor.u32 %v2101_v15, %v4165_v10  ;;  %v2104_v25 = vrot.slane %v4165_v10, 4  ;;  %v4182_v33 = vor.u32 %v2109_v26, %v4167_v53  ;;  %v2112_v42 = vrot.slane %v4167_v53, 4  ;;  %v2480_v10 = vld [vmem:[%s4585_s4 + $0x6c] sm:$0x1] }
 0x35b   :  { %v4185_v23 = vrot.slane %v2114_v39, 7  ;;  %v4187_v21 = vrot.slane %v2122_v40, 7  ;;  %v2130_v17 = vshrl.u32 %v2524_v44, 16  ;;  %v2133_v34 = vshll.u32 %v2524_v44, 16  ;;  %v2444_v39 = vld [vmem:[%s4585_s4 + $0x14] sm:$0x1] }
 0x35c   :  { %v2138_v31 = vshrl.u32 %v2525_v61, 16  ;;  %v2141_v4 = vshll.u32 %v2525_v61, 16  ;;  %v2146_v8 = vshrl.u32 %v2526_v16, 16  ;;  %v2149_v28 = vshll.u32 %v2526_v16, 16 }
 0x35d   :  { %v4190_v52 = vor.u32 %v2117_v27, %v4185_v23  ;;  %v2120_v50 = vrot.slane %v4185_v23, 4  ;;  %v4194_v12 = vor.u32 %v2125_v62, %v4187_v21  ;;  %v2128_v14 = vrot.slane %v4187_v21, 4  ;;  %v2486_v23 = vld [vmem:[%s4585_s4 + $0x78] sm:$0xf] }
 0x35e   :  { %v4197_v32 = vrot.slane %v2130_v17, 7  ;;  %v4199_v55 = vrot.slane %v2138_v31, 7  ;;  %v4201_v36 = vrot.slane %v2146_v8, 7  ;;  %v2154_v7 = vshrl.u32 %v4147_v5, 16  ;;  %v2448_v31 = vld [vmem:[%s4585_s4 + $0x1c] sm:$0x1] }
 0x35f   :  { %v2157_v30 = vshll.u32 %v4147_v5, 16  ;;  %v2162_v37 = vshrl.u32 %v4149_v19, 16  ;;  %v2165_v57 = vshll.u32 %v4149_v19, 16  ;;  %v2170_v38 = vshrl.u32 %v4151_v35, 16  ;;  %v2438_v5 = vld [vmem:[%s4585_s4 + $0x8] sm:$0xf] }
 0x360   :  { %v4209_v46 = vor.u32 %v2133_v34, %v4197_v32  ;;  %v2136_v2 = vrot.slane %v4197_v32, 4  ;;  %v4213_v3 = vor.u32 %v2141_v4, %v4199_v55  ;;  %v2144_v18 = vrot.slane %v4199_v55, 4  ;;  %v2446_v34 = vld [vmem:[%s4585_s4 + $0x18] sm:$0xf]  ;;  %v2450_v4 = vld [vmem:[%s4585_s4 + $0x20] sm:$0xf] }
 0x361   :  { %v4217_v29 = vor.u32 %v2149_v28, %v4201_v36  ;;  %v2152_v0 = vrot.slane %v4201_v36, 4  ;;  %v4220_v20 = vrot.slane %v2154_v7, 7  ;;  %v4222_v13 = vrot.slane %v2162_v37, 7  ;;  %v2456_v37 = vld [vmem:[%s4585_s4 + $0x2c] sm:$0x1] }
 0x362   :  { %v4224_v56 = vrot.slane %v2170_v38, 7  ;;  %v2173_v44 = vshll.u32 %v4151_v35, 16  ;;  %v2178_v61 = vshrl.u32 %v4153_v11, 16  ;;  %v2181_v16 = vshll.u32 %v4153_v11, 16  ;;  %v2440_v35 = vld [vmem:[%s4585_s4 + $0xc] sm:$0x1] }
 0x363   :  { %v4233_v19 = vor.u32 %v2157_v30, %v4220_v20  ;;  %v2160_v59 = vrot.slane %v4220_v20, 4  ;;  %v4237_v54 = vor.u32 %v2165_v57, %v4222_v13  ;;  %v2168_v1 = vrot.slane %v4222_v13, 4  ;;  %v2442_v11 = vld [vmem:[%s4585_s4 + $0x10] sm:$0xf]  ;;  %v2454_v30 = vld [vmem:[%s4585_s4 + $0x28] sm:$0xf] }
 0x364   :  { %v4253_v48 = vor.u32 %v2173_v44, %v4224_v56  ;;  %v2176_v15 = vrot.slane %v4224_v56, 4  ;;  %v4256_v49 = vrot.slane %v2178_v61, 7  ;;  %v2186_v26 = vshrl.u32 %v4155_v45, 16  ;;  %v2458_v57 = vld [vmem:[%s4585_s4 + $0x30] sm:$0xf] }
 0x365   :  { %v2189_v27 = vshll.u32 %v4155_v45, 16  ;;  %v2194_v40 = vshrl.u32 %v4157_v47, 16  ;;  %v2197_v62 = vshll.u32 %v4157_v47, 16  ;;  %v2202_v17 = vshrl.u32 %v4159_v22, 16  ;;  %v2452_v45 = vld [vmem:[%s4585_s4 + $0x24] sm:$0x1] }
 0x366   :  { %v4279_v47 = vor.u32 %v2181_v16, %v4256_v49  ;;  %v2184_v8 = vrot.slane %v4256_v49, 4  ;;  %v4282_v28 = vrot.slane %v2186_v26, 7  ;;  %v2205_v7 = vshll.u32 %v4159_v22, 16  ;;  %v2460_v38 = vld [vmem:[%s4585_s4 + $0x34] sm:$0x1] }
 0x367   :  { %v4297_v44 = vrot.slane %v2194_v40, 7  ;;  %v4299_v61 = vrot.slane %v2202_v17, 7  ;;  %v2245_v22 = vsel %vm4248_vm7, %v4170_v51, %v2438_v5  ;;  %v2248_v16 = vsel %vm3714_vm6, %v2088_v24, %v2440_v35  ;;  %v2462_v26 = vld [vmem:[%s4585_s4 + $0x38] sm:$0xf]  ;;  %v2464_v40 = vld [vmem:[%s4585_s4 + $0x3c] sm:$0x1] }
 0x368   :  { %v2466_v17 = vld [vmem:[%s4585_s4 + $0x40] sm:$0xf]  ;;  %v2468_v51 = vld [vmem:[%s4585_s4 + $0x44] sm:$0x1]  ;;  %v4321_v41 = vor.u32 %v2189_v27, %v4282_v28  ;;  %2439 = vst [vmem:[%s4585_s4 + $0x8] sm:$0xf] %v2245_v22  ;;  %v2251_v5 = vsel %vm4248_vm7, %v4174_v63, %v2442_v11  ;;  %v2254_v35 = vsel %vm3714_vm6, %v2096_v60, %v2444_v39  ;;  %v2257_v39 = vsel %vm4248_vm7, %v4178_v6, %v2446_v34 }
 0x369   :  { %2441 = vst [vmem:[%s4585_s4 + $0xc] sm:$0x1] %v2248_v16  ;;  %v2470_v27 = vld [vmem:[%s4585_s4 + $0x58] sm:$0xf]  ;;  %v2472_v22 = vld [vmem:[%s4585_s4 + $0x5c] sm:$0x1]  ;;  %v4344_v24 = vor.u32 %v2197_v62, %v4297_v44  ;;  %v4348_v63 = vor.u32 %v2205_v7, %v4299_v61  ;;  %v2260_v62 = vsel %vm3714_vm6, %v2104_v25, %v2448_v31  ;;  %v2263_v7 = vsel %vm4248_vm7, %v4182_v33, %v2450_v4 }
 0x36a   :  { %v2200_v16 = vrot.slane %v4297_v44, 4  ;;  %v2208_v43 = vrot.slane %v4299_v61, 4  ;;  %2443 = vst [vmem:[%s4585_s4 + $0x10] sm:$0xf] %v2251_v5  ;;  %2445 = vst [vmem:[%s4585_s4 + $0x14] sm:$0x1] %v2254_v35  ;;  %v2266_v5 = vsel %vm3714_vm6, %v2112_v42, %v2452_v45  ;;  %v2269_v53 = vsel %vm4248_vm7, %v4190_v52, %v2454_v30 }
 0x36b   :  { %v2474_v60 = vld [vmem:[%s4585_s4 + $0x60] sm:$0xf]  ;;  %v2476_v11 = vld [vmem:[%s4585_s4 + $0x64] sm:$0x1]  ;;  %v2478_v35 = vld [vmem:[%s4585_s4 + $0x68] sm:$0xf]  ;;  %v2272_v25 = vsel %vm3714_vm6, %v2120_v50, %v2456_v37  ;;  %v2275_v33 = vsel %vm4248_vm7, %v4194_v12, %v2458_v57  ;;  %v2278_v42 = vsel %vm3714_vm6, %v2128_v14, %v2460_v38  ;;  %v2281_v21 = vsel %vm4248_vm7, %v4209_v46, %v2462_v26 }
 0x36c   :  { %v2482_v6 = vld [vmem:[%s4585_s4 + $0x70] sm:$0xf]  ;;  %2447 = vst [vmem:[%s4585_s4 + $0x18] sm:$0xf] %v2257_v39  ;;  %2449 = vst [vmem:[%s4585_s4 + $0x1c] sm:$0x1] %v2260_v62  ;;  %v2284_v50 = vsel %vm3714_vm6, %v2136_v2, %v2464_v40  ;;  %v2287_v12 = vsel %vm4248_vm7, %v4213_v3, %v2466_v17  ;;  %v2290_v14 = vsel %vm3714_vm6, %v2144_v18, %v2468_v51 }
 0x36d   :  { %2451 = vst [vmem:[%s4585_s4 + $0x20] sm:$0xf] %v2263_v7  ;;  %2453 = vst [vmem:[%s4585_s4 + $0x24] sm:$0x1] %v2266_v5  ;;  %v2484_v34 = vld [vmem:[%s4585_s4 + $0x74] sm:$0x1]  ;;  %v2293_v55 = vsel %vm4248_vm7, %v4217_v29, %v2470_v27  ;;  %v2296_v2 = vsel %vm3714_vm6, %v2152_v0, %v2472_v22  ;;  %v2299_v3 = vsel %vm4248_vm7, %v4233_v19, %v2474_v60 }
 0x36e   :  { %v2488_v52 = vld [vmem:[%s4585_s4 + $0x7c] sm:$0x1]  ;;  %2455 = vst [vmem:[%s4585_s4 + $0x28] sm:$0xf] %v2269_v53  ;;  %2457 = vst [vmem:[%s4585_s4 + $0x2c] sm:$0x1] %v2272_v25  ;;  %v2302_v18 = vsel %vm3714_vm6, %v2160_v59, %v2476_v11  ;;  %v2305_v0 = vsel %vm4248_vm7, %v4237_v54, %v2478_v35  ;;  %v2308_v20 = vsel %vm3714_vm6, %v2168_v1, %v2480_v10 }
 0x36f   :  { %2459 = vst [vmem:[%s4585_s4 + $0x30] sm:$0xf] %v2275_v33  ;;  %2461 = vst [vmem:[%s4585_s4 + $0x34] sm:$0x1] %v2278_v42  ;;  %v2490_v31 = vld [vmem:[%s4585_s4 + $0x80] sm:$0xf]  ;;  %v2311_v19 = vsel %vm4248_vm7, %v4253_v48, %v2482_v6  ;;  %v2314_v59 = vsel %vm3714_vm6, %v2176_v15, %v2484_v34  ;;  %v2317_v13 = vsel %vm4248_vm7, %v4279_v47, %v2486_v23 }
 0x370   :  { %v2492_v32 = vld [vmem:[%s4585_s4 + $0x84] sm:$0x1]  ;;  %v2494_v46 = vld [vmem:[%s4585_s4 + $0x88] sm:$0xf]  ;;  %2463 = vst [vmem:[%s4585_s4 + $0x38] sm:$0xf] %v2281_v21  ;;  %v2320_v56 = vsel %vm3714_vm6, %v2184_v8, %v2488_v52  ;;  %v2323_v54 = vsel %vm4248_vm7, %v4321_v41, %v2490_v31 }
 0x371   :  { %2465 = vst [vmem:[%s4585_s4 + $0x3c] sm:$0x1] %v2284_v50  ;;  %2467 = vst [vmem:[%s4585_s4 + $0x40] sm:$0xf] %v2287_v12  ;;  %v2496_v4 = vld [vmem:[%s4585_s4 + $0x8c] sm:$0x1]  ;;  %v2329_v15 = vsel %vm4248_vm7, %v4344_v24, %v2494_v46 }
 0x372   :  { %2469 = vst [vmem:[%s4585_s4 + $0x44] sm:$0x1] %v2290_v14  ;;  %v2498_v36 = vld [vmem:[%s4585_s4 + $0x90] sm:$0xf]  ;;  %v2500_v29 = vld [vmem:[%s4585_s4 + $0x94] sm:$0x1]  ;;  %v2332_v49 = vsel %vm3714_vm6, %v2200_v16, %v2496_v4 }
 0x373   :  { %2471 = vst [vmem:[%s4585_s4 + $0x58] sm:$0xf] %v2293_v55  ;;  %2473 = vst [vmem:[%s4585_s4 + $0x5c] sm:$0x1] %v2296_v2  ;;  %v4628_v1 = vrot.slane %v4282_v28, 4  ;;  %v2335_v45 = vsel %vm4248_vm7, %v4348_v63, %v2498_v36  ;;  %v2338_v47 = vsel %vm3714_vm6, %v2208_v43, %v2500_v29 }
 0x374   :  { %2475 = vst [vmem:[%s4585_s4 + $0x60] sm:$0xf] %v2299_v3  ;;  %2477 = vst [vmem:[%s4585_s4 + $0x64] sm:$0x1] %v2302_v18 }
 0x375   :  { %2479 = vst [vmem:[%s4585_s4 + $0x68] sm:$0xf] %v2305_v0  ;;  %2481 = vst [vmem:[%s4585_s4 + $0x6c] sm:$0x1] %v2308_v20  ;;  %v2326_v48 = vsel %vm3714_vm6, %v4628_v1, %v2492_v32 }
 0x376   :  { %2483 = vst [vmem:[%s4585_s4 + $0x70] sm:$0xf] %v2311_v19  ;;  %2485 = vst [vmem:[%s4585_s4 + $0x74] sm:$0x1] %v2314_v59 }
 0x377   :  { %2487 = vst [vmem:[%s4585_s4 + $0x78] sm:$0xf] %v2317_v13  ;;  %2489 = vst [vmem:[%s4585_s4 + $0x7c] sm:$0x1] %v2320_v56 }
 0x378   :  { %2491 = vst [vmem:[%s4585_s4 + $0x80] sm:$0xf] %v2323_v54  ;;  %2493 = vst [vmem:[%s4585_s4 + $0x84] sm:$0x1] %v2326_v48 }
 0x379   :  { %2495 = vst [vmem:[%s4585_s4 + $0x88] sm:$0xf] %v2329_v15  ;;  %2497 = vst [vmem:[%s4585_s4 + $0x8c] sm:$0x1] %v2332_v49 }
 0x37a   :  { %2499 = vst [vmem:[%s4585_s4 + $0x90] sm:$0xf] %v2335_v45  ;;  %2501 = vst [vmem:[%s4585_s4 + $0x94] sm:$0x1] %v2338_v47 }

</bundles_post_ra>
